<compile_context>
chip_gen: v6e
topology: v6e:2x2x1
jax: 0.10.0
libtpu: 0.0.40
codegen_flags: <defaults>
</compile_context>

<pallas_src>
import jax
import jax.numpy as jnp
from jax.experimental import pallas as pl
from jax.experimental.pallas import tpu as pltpu


_LANE = 128
_SUBLANE = 8
_NUM_DIST_BUCKETS = 10
_NB_PAD = 16          # padded bucket count (>= 10, multiple of 8)


def _round_up(x, m):
    return ((x + m - 1) // m) * m


def _pad_to(a, shape):
    pads = [(0, s - d) for d, s in zip(a.shape, shape)]
    return jnp.pad(a, pads)


# ----------------------------------------------------------------------------
# Pallas kernel: one attention-propagation iteration for one (batch, row tile).
# ----------------------------------------------------------------------------
def _att_prop_kernel(xkb_ref, right_ref, maskb_ref, bucket_ref,
                     wqg_ref, wpd_ref, w2_ref, b2_ref, w3_ref,
                     wgc_ref, bg_ref, out_ref, pk_ref):
    f32 = jnp.float32
    bf16 = jnp.bfloat16

    N, Dp = xkb_ref.shape[1], xkb_ref.shape[2]
    T = out_ref.shape[1]
    Hp = right_ref.shape[2]
    NB = pk_ref.shape[1] - Dp

    xkb = xkb_ref[0]                          # (N, Dp) bf16 keys (cast hoisted)
    right = right_ref[0]                      # (N, Hp) f32   x@Wr + b1 (hoisted)
    mask_bias = maskb_ref[0].astype(f32)      # (T, N)  additive mask bias
    buckets = bucket_ref[0]                   # (T, N)  int32 distance buckets

    # Query tile = rows [r*T, (r+1)*T) of the already-resident key block
    # (no second x input stream).
    r0 = pl.multiple_of(pl.program_id(1) * T, T)
    xqb = xkb_ref[0, pl.ds(r0, T), :]         # (T, Dp) bf16

    # --- fused query-side matmul: xq @ [Wl | Wgx] ----------------------------
    qh = jnp.dot(xqb, wqg_ref[...], preferred_element_type=f32)   # (T, Hp+Dp)
    left = qh[:, :Hp]
    gate_x = qh[:, Hp:]

    # --- pairwise product + distance one-hot as ONE K=(Dp+NB) operand --------
    # (single MXU pass against [[Wp],[Tdist]] — no separate dist_h temp / add)
    pk_ref[:, :Dp] = (xqb[:, None, :] * xkb[None, :, :]).reshape(T * N, Dp)
    iota = jax.lax.broadcasted_iota(jnp.int32, (T, N, NB), 2)
    pk_ref[:, Dp:] = (buckets[:, :, None] == iota).astype(bf16).reshape(T * N, NB)

    # --- pair FF scorer (dim_output = 1); b3 dropped (softmax shift-invariant)
    h1 = jnp.dot(pk_ref[...], wpd_ref[...], preferred_element_type=f32)
    h1 = h1.reshape(T, N, Hp) + left[:, None, :] + right[None, :, :]
    h1 = jnp.maximum(h1, 0.0).astype(bf16).reshape(T * N, Hp)

    h2 = jnp.dot(h1, w2_ref[...], preferred_element_type=f32) + b2_ref[0][None, :]
    h2 = jnp.maximum(h2, 0.0).reshape(T, N, Hp)
    scores = jnp.sum(h2 * w3_ref[0][None, None, :], axis=-1) + mask_bias   # (T, N)

    # --- masked softmax over keys (mask already additive, like the reference)
    m = jnp.max(scores, axis=-1, keepdims=True)
    e = jnp.exp(scores - m)
    probs = e * pl.reciprocal(jnp.sum(e, axis=-1, keepdims=True), approx=True)

    # --- context + gated update ----------------------------------------------
    ctxt = jnp.dot(probs.astype(bf16), xkb, preferred_element_type=f32)    # (T, Dp)
    g = jax.nn.sigmoid(gate_x
                       + jnp.dot(ctxt.astype(bf16), wgc_ref[...],
                                 preferred_element_type=f32)
                       + bg_ref[0][None, :])
    # NOTE: x enters the blend via the bf16 key block (deliberate precision
    # tradeoff; the whole scorer already runs in bf16 on the MXU).
    out_ref[0] = (g * xqb.astype(f32) + (1.0 - g) * ctxt).astype(out_ref.dtype)


# ----------------------------------------------------------------------------
# VMEM sizing: generation-aware budget + explicit live-byte accounting.
# ----------------------------------------------------------------------------
def _vmem_budget():
    """Returns (tile working-set budget, scoped vmem limit), per chip generation."""
    try:
        cap = int(pltpu.get_tpu_info().vmem_capacity_bytes)
    except Exception:
        cap = 64 * 1024 * 1024       # conservative fallback: fits v7x (64 MiB)
    # 128 MiB (v5e/v6e) -> 48 / 96 MiB; 64 MiB (v7x) -> 24 / 48 MiB.
    return (cap * 3) // 8, (cap * 3) // 4


def _choose_tile_n(n_keys, d_pad, h_pad, nb, weight_bytes, budget_bytes):
    """Largest query-row tile (multiple of 8, <=128) whose live VMEM fits budget."""
    # T-independent residents (double-buffered by the pipeline):
    fixed = (2 * n_keys * d_pad * 2        # x keys, bf16
             + 2 * n_keys * h_pad * 4      # right = x@Wr + b1, f32
             + 2 * weight_bytes)           # loop-invariant weights (2x-buffered)
    # Bytes that scale with one query row, counted with margin:
    per_pair = (2 * (d_pad + nb)           # pk scratch (bf16, single buffer)
                + 2 * d_pad + 2 * nb       # product / one-hot values pre-store
                + 14 * h_pad               # h1 f32 + h1 bf16 + h2 f32 (+margin)
                + 2 * 2 + 4                # mask bias (2x bf16) + f32 widened copy
                + 2 * 4                    # bucket stream (2x int32)
                + 24)                      # scores / exp / probs row temporaries
    per_row = (n_keys * per_pair
               + 2 * 4 * d_pad             # output tile (2x-buffered f32)
               + 8 * (h_pad + d_pad))      # qh / gate / ctxt row temporaries
    t = (budget_bytes - fixed) // max(per_row, 1)
    t = int(max(_SUBLANE, min(128, t)))
    return (t // _SUBLANE) * _SUBLANE


# ----------------------------------------------------------------------------
# One iteration over the whole (padded) batch.
# ----------------------------------------------------------------------------
def _att_prop_step(xkb, right, mask_bias, buckets, w, tile_n, vmem_limit_bytes):
    B, n_pad, d_pad = xkb.shape
    h_pad = right.shape[-1]
    k_dim = w['Wpd'].shape[0]              # d_pad + _NB_PAD

    def row_spec(s2, s3):
        return pl.BlockSpec((1, s2, s3), lambda b, r: (b, r, 0))

    def batch_spec(s2, s3):
        return pl.BlockSpec((1, s2, s3), lambda b, r: (b, 0, 0))

    def wspec(shape):
        return pl.BlockSpec(shape, lambda b, r: (0,) * len(shape))

    return pl.pallas_call(
        _att_prop_kernel,
        out_shape=jax.ShapeDtypeStruct((B, n_pad, d_pad), jnp.float32),
        grid=(B, n_pad // tile_n),
        in_specs=[
            batch_spec(n_pad, d_pad),            # x keys (bf16), resident per batch
            batch_spec(n_pad, h_pad),            # right = x@Wr + b1 (f32), resident
            row_spec(tile_n, n_pad),             # additive mask bias (bf16) rows
            row_spec(tile_n, n_pad),             # distance buckets (int32) rows
            wspec(w['Wqg'].shape),               # [Wl | Wgx]
            wspec(w['Wpd'].shape),               # [[Wp],[dist_emb_table @ Wd]]
            wspec(w['W2'].shape),
            wspec(w['b2'].shape),
            wspec(w['w3'].shape),
            wspec(w['Wgc'].shape),
            wspec(w['bg'].shape),
        ],
        out_specs=row_spec(tile_n, d_pad),
        scratch_shapes=[pltpu.VMEM((tile_n * n_pad, k_dim), jnp.bfloat16)],
        compiler_params=pltpu.CompilerParams(
            dimension_semantics=("parallel", "parallel"),
            vmem_limit_bytes=vmem_limit_bytes),
    )(xkb, right, mask_bias, buckets,
      w['Wqg'], w['Wpd'], w['W2'], w['b2'], w['w3'], w['Wgc'], w['bg'])


# ----------------------------------------------------------------------------
# Glue: distance bucketing, weight prep (padding / fusing), span scatter.
# ----------------------------------------------------------------------------
def _bucket_distance(d):
    # standard 10-way log buckets: 0,1,2,3,4, 5-7, 8-15, 16-31, 32-63, 64+
    d = jnp.abs(d)
    log_bucket = jnp.floor(
        jnp.log2(jnp.maximum(d, 1).astype(jnp.float32))).astype(jnp.int32) + 3
    return jnp.where(d <= 4, d, jnp.minimum(log_bucket, _NUM_DIST_BUCKETS - 1))


def _prepare_weights(params, d_pad, h_pad):
    f32, bf16 = jnp.float32, jnp.bfloat16
    # loop-invariant fold of the distance embedding through Wd: (NB, H)
    table_h = jnp.dot(params['dist_emb_table'], params['Wd'])
    wl = _pad_to(params['Wl'], (d_pad, h_pad))
    wgx = _pad_to(params['Wgx'], (d_pad, d_pad))
    wp = _pad_to(params['Wp'], (d_pad, h_pad))
    tdist = _pad_to(table_h, (_NB_PAD, h_pad))
    return {
        # --- kernel weights ---
        'Wqg': jnp.concatenate([wl, wgx], axis=1).astype(bf16),     # (Dp, Hp+Dp)
        'Wpd': jnp.concatenate([wp, tdist], axis=0).astype(bf16),   # (Dp+NB, Hp)
        'W2': _pad_to(params['W2'], (h_pad, h_pad)).astype(bf16),
        'b2': _pad_to(params['b2'], (1, h_pad)).astype(f32),
        'w3': _pad_to(params['w3'], (1, h_pad)).astype(f32),
        'Wgc': _pad_to(params['Wgc'], (d_pad, d_pad)).astype(bf16),
        'bg': _pad_to(params['bg'], (1, d_pad)).astype(f32),
        # --- wrapper-side (hoisted key-side preactivation right = x@Wr + b1) ---
        'Wr': _pad_to(params['Wr'], (d_pad, h_pad)).astype(bf16),
        'b1': _pad_to(params['b1'], (1, h_pad)).astype(f32),
        # b3 dropped: a constant bias on every pair score is a softmax no-op.
    }


_KERNEL_WEIGHT_KEYS = ('Wqg', 'Wpd', 'W2', 'b2', 'w3', 'Wgc', 'bg')


def _overwrite_spans_hoi(cand_span_vecs, prune_indices, span_lengths, update):
    # scatter updated filtered spans back into the candidate span tensor
    B, N = prune_indices.shape
    M = cand_span_vecs.shape[1]
    valid = jnp.arange(N)[None, :] < span_lengths[:, None]

    def per_batch(cand_b, idx_b, upd_b, valid_b):
        safe_idx = jnp.where(valid_b, idx_b, M)        # OOB rows are dropped
        return cand_b.at[safe_idx].set(upd_b, mode='drop')

    return jax.vmap(per_batch)(cand_span_vecs, prune_indices, update, valid)


def module_attention_prop_hoi(all_spans, filtered_spans, params, att_prop):
    update = filtered_spans['span_vecs']
    span_begin = filtered_spans['span_begin']
    if update is None or att_prop <= 0:
        return all_spans, filtered_spans

    square_mask = filtered_spans['square_mask']
    B, N, D = update.shape
    H = params['Wl'].shape[1]

    d_pad = _round_up(D, _LANE)
    h_pad = _round_up(H, _LANE)
    n8 = _round_up(N, _SUBLANE)

    w = _prepare_weights(params, d_pad, h_pad)
    weight_bytes = sum(int(w[k].size) * w[k].dtype.itemsize
                       for k in _KERNEL_WEIGHT_KEYS)

    tile_budget, vmem_limit = _vmem_budget()
    tile_n = min(_choose_tile_n(n8, d_pad, h_pad, _NB_PAD,
                                weight_bytes, tile_budget), n8)
    n_pad = _round_up(N, tile_n)

    # TODO(synk): span_pair_generator internals approximated as
    # |begin_i - begin_j| log-bucket distance embeddings (Lee et al. buckets).
    buckets = _bucket_distance(span_begin[:, :, None] - span_begin[:, None, :])
    buckets = _pad_to(buckets.astype(jnp.int32), (B, n_pad, n_pad))

    x = _pad_to(update.astype(jnp.float32), (B, n_pad, d_pad))
    mask = _pad_to(square_mask.astype(jnp.float32), (B, n_pad, n_pad))
    # additive mask bias: 0 where attendable, -1e30 where masked / padded
    mask_bias = ((mask - 1.0) * 1e30).astype(jnp.bfloat16)

    for _ in range(att_prop):
        xkb = x.astype(jnp.bfloat16)                         # cast hoisted (once/iter)
        right = jnp.dot(xkb, w['Wr'],                        # key-side preact hoisted:
                        preferred_element_type=jnp.float32) + w['b1']   # x@Wr + b1
        x = _att_prop_step(xkb, right, mask_bias, buckets, w, tile_n, vmem_limit)

    update_new = x[:, :N, :D].astype(update.dtype)

    update_all = dict(all_spans)
    update_filtered = dict(filtered_spans)
    update_filtered['span_vecs'] = update_new
    update_all['cand_span_vecs'] = _overwrite_spans_hoi(
        all_spans['cand_span_vecs'],
        filtered_spans['prune_indices_hoi'],
        filtered_spans['span_lengths'],
        update_new)
    return update_all, update_filtered


def init_params(key, D, H, Ed, std, num_dist_buckets=_NUM_DIST_BUCKETS):
    ks = jax.random.split(key, 10)
    n = lambda k, shape: (jax.random.normal(k, shape, jnp.float32) * std)
    z = lambda shape: jnp.zeros(shape, jnp.float32)
    return {
        'dist_emb_table': n(ks[0], (num_dist_buckets, Ed)),
        'Wl': n(ks[1], (D, H)),
        'Wr': n(ks[2], (D, H)),
        'Wp': n(ks[3], (D, H)),
        'Wd': n(ks[4], (Ed, H)),
        'b1': z((1, H)),
        'W2': n(ks[5], (H, H)),
        'b2': z((1, H)),
        'w3': n(ks[6], (1, H)),
        'b3': z((1, 1)),
        'Wgx': n(ks[7], (D, D)),
        'Wgc': n(ks[8], (D, D)),
        'bg': z((1, D)),
    }


if __name__ == "__main__":
    key = jax.random.PRNGKey(0)
    B, M, N, D, H, Ed = 2, 16, 8, 32, 32, 16
    att_prop = 2
    init_weights_std = 0.02

    k_param, k_cand, k_span, k_begin, k_mask, k_perm = jax.random.split(key, 6)
    params = init_params(k_param, D, H, Ed, init_weights_std)

    cand_span_vecs = jax.random.normal(k_cand, (B, M, D), jnp.float32)
    span_vecs = jax.random.normal(k_span, (B, N, D), jnp.float32)
    span_begin = jnp.sort(
        jax.random.randint(k_begin, (B, N), 0, 50, jnp.int32), axis=-1)
    span_end = span_begin + 2

    square_mask = jax.random.bernoulli(k_mask, 0.7, (B, N, N)).astype(jnp.float32)
    eye = jnp.eye(N, dtype=jnp.float32)[None]
    square_mask = jnp.maximum(square_mask, eye)        # keep diagonal valid

    prune_indices = jnp.stack(
        [jnp.sort(jax.random.permutation(jax.random.fold_in(k_perm, b), M)[:N])
         for b in range(B)]).astype(jnp.int32)
    span_lengths = jnp.array([N, N - 2], jnp.int32)

    all_spans = {'cand_span_vecs': cand_span_vecs}
    filtered_spans = {
        'span_vecs': span_vecs,
        'span_begin': span_begin,
        'span_end': span_end,
        'square_mask': square_mask,
        'prune_indices_hoi': prune_indices,
        'span_lengths': span_lengths,
    }

    out_all, out_filtered = module_attention_prop_hoi(
        all_spans, filtered_spans, params, att_prop)

    jax.block_until_ready(out_filtered['span_vecs'])
    jax.block_until_ready(out_all['cand_span_vecs'])
    assert out_filtered['span_vecs'].shape == (B, N, D)
    assert out_all['cand_span_vecs'].shape == (B, M, D)
    assert bool(jnp.all(jnp.isfinite(out_filtered['span_vecs'])))
    print("KERNEL_OK")
</pallas_src>

<mosaic_0001>
module attributes {stable_mosaic.version = 11 : i64} {
  func.func @_att_prop_kernel(%arg0: i32, %arg1: i32, %arg2: memref<1x8x128xbf16, #tpu.memory_space<vmem>>, %arg3: memref<1x8x128xf32, #tpu.memory_space<vmem>>, %arg4: memref<1x8x8xbf16, #tpu.memory_space<vmem>>, %arg5: memref<1x8x8xi32, #tpu.memory_space<vmem>>, %arg6: memref<128x256xbf16, #tpu.memory_space<vmem>>, %arg7: memref<144x128xbf16, #tpu.memory_space<vmem>>, %arg8: memref<128x128xbf16, #tpu.memory_space<vmem>>, %arg9: memref<1x128xf32, #tpu.memory_space<vmem>>, %arg10: memref<1x128xf32, #tpu.memory_space<vmem>>, %arg11: memref<128x128xbf16, #tpu.memory_space<vmem>>, %arg12: memref<1x128xf32, #tpu.memory_space<vmem>>, %arg13: memref<1x8x128xf32, #tpu.memory_space<vmem>>, %arg14: memref<64x144xbf16, #tpu.memory_space<vmem>>) attributes {dimension_semantics = [#tpu.dimension_semantics<parallel>, #tpu.dimension_semantics<parallel>], iteration_bounds = array<i64: 2, 1>, scalar_prefetch = 0 : i64, scratch_operands = 1 : i64, tpu.core_type = #tpu.core_type<tc>, window_params = [{transform_indices = @transform_0, window_bounds = array<i64: 1, 8, 128>}, {transform_indices = @transform_1, window_bounds = array<i64: 1, 8, 128>}, {transform_indices = @transform_2, window_bounds = array<i64: 1, 8, 8>}, {transform_indices = @transform_3, window_bounds = array<i64: 1, 8, 8>}, {pipeline_mode = #tpu.pipeline_mode<synchronous>, transform_indices = @transform_4, window_bounds = array<i64: 128, 256>}, {pipeline_mode = #tpu.pipeline_mode<synchronous>, transform_indices = @transform_5, window_bounds = array<i64: 144, 128>}, {pipeline_mode = #tpu.pipeline_mode<synchronous>, transform_indices = @transform_6, window_bounds = array<i64: 128, 128>}, {pipeline_mode = #tpu.pipeline_mode<synchronous>, transform_indices = @transform_7, window_bounds = array<i64: 1, 128>}, {pipeline_mode = #tpu.pipeline_mode<synchronous>, transform_indices = @transform_8, window_bounds = array<i64: 1, 128>}, {pipeline_mode = #tpu.pipeline_mode<synchronous>, transform_indices = @transform_9, window_bounds = array<i64: 128, 128>}, {pipeline_mode = #tpu.pipeline_mode<synchronous>, transform_indices = @transform_10, window_bounds = array<i64: 1, 128>}, {transform_indices = @transform_11, window_bounds = array<i64: 1, 8, 128>}]} {
    %c0 = arith.constant 0 : index
    %c0_0 = arith.constant 0 : index
    %c0_1 = arith.constant 0 : index
    %0 = vector.load %arg2[%c0, %c0_0, %c0_1] : memref<1x8x128xbf16, #tpu.memory_space<vmem>>, vector<1x8x128xbf16>
    %1 = vector.shape_cast %0 : vector<1x8x128xbf16> to vector<8x128xbf16>
    %c0_2 = arith.constant 0 : index
    %c0_3 = arith.constant 0 : index
    %c0_4 = arith.constant 0 : index
    %2 = vector.load %arg3[%c0_2, %c0_3, %c0_4] : memref<1x8x128xf32, #tpu.memory_space<vmem>>, vector<1x8x128xf32>
    %3 = vector.shape_cast %2 : vector<1x8x128xf32> to vector<8x128xf32>
    %c0_5 = arith.constant 0 : index
    %c0_6 = arith.constant 0 : index
    %c0_7 = arith.constant 0 : index
    %4 = vector.load %arg4[%c0_5, %c0_6, %c0_7] : memref<1x8x8xbf16, #tpu.memory_space<vmem>>, vector<1x8x8xbf16>
    %5 = vector.shape_cast %4 : vector<1x8x8xbf16> to vector<8x8xbf16>
    %6 = arith.extf %5 : vector<8x8xbf16> to vector<8x8xf32>
    %c0_8 = arith.constant 0 : index
    %c0_9 = arith.constant 0 : index
    %c0_10 = arith.constant 0 : index
    %7 = vector.load %arg5[%c0_8, %c0_9, %c0_10] : memref<1x8x8xi32, #tpu.memory_space<vmem>>, vector<1x8x8xi32>
    %8 = vector.shape_cast %7 : vector<1x8x8xi32> to vector<8x8xi32>
    %c8_i32 = arith.constant 8 : i32
    %9 = arith.muli %arg1, %c8_i32 : i32
    %10 = tpu.assume_multiple %9, 8 : i32
    %c0_11 = arith.constant 0 : index
    %11 = arith.index_cast %10 : i32 to index
    %c0_12 = arith.constant 0 : index
    %12 = vector.load %arg2[%c0_11, %11, %c0_12] : memref<1x8x128xbf16, #tpu.memory_space<vmem>>, vector<1x8x128xbf16>
    %13 = vector.shape_cast %12 : vector<1x8x128xbf16> to vector<8x128xbf16>
    %c0_13 = arith.constant 0 : index
    %c0_14 = arith.constant 0 : index
    %14 = vector.load %arg6[%c0_13, %c0_14] : memref<128x256xbf16, #tpu.memory_space<vmem>>, vector<128x256xbf16>
    %cst = arith.constant dense<0.000000e+00> : vector<8x256xf32>
    %15 = tpu.matmul %13, %14, %cst {dimension_numbers = #tpu.dot_dimension_numbers<[1], [0], [0], [1], [0, 0, 1, 1], [], []>} : vector<8x128xbf16>, vector<128x256xbf16>, vector<8x256xf32> -> vector<8x256xf32>
    %16 = vector.extract_strided_slice %15 {offsets = [0, 0], sizes = [8, 128], strides = [1, 1]} : vector<8x256xf32> to vector<8x128xf32>
    %17 = vector.extract_strided_slice %15 {offsets = [0, 128], sizes = [8, 128], strides = [1, 1]} : vector<8x256xf32> to vector<8x128xf32>
    %18 = vector.shape_cast %13 : vector<8x128xbf16> to vector<8x1x128xbf16>
    %19 = vector.shape_cast %1 : vector<8x128xbf16> to vector<1x8x128xbf16>
    %20 = vector.broadcast %18 : vector<8x1x128xbf16> to vector<8x8x128xbf16>
    %21 = vector.broadcast %19 : vector<1x8x128xbf16> to vector<8x8x128xbf16>
    %22 = arith.mulf %20, %21 : vector<8x8x128xbf16>
    %23 = vector.shape_cast %22 : vector<8x8x128xbf16> to vector<64x128xbf16>
    %c0_15 = arith.constant 0 : index
    %c0_16 = arith.constant 0 : index
    %24 = vector.load %arg14[%c0_15, %c0_16] : memref<64x144xbf16, #tpu.memory_space<vmem>>, vector<64x128xbf16>
    tpu.vector_store %arg14[%c0_15, %c0_16], %23 {strides = array<i32>} : memref<64x144xbf16, #tpu.memory_space<vmem>>, vector<64x128xbf16>,
    %25 = tpu.iota {dimensions = array<i32: 2>} : vector<8x8x16xi32>
    %26 = vector.shape_cast %8 : vector<8x8xi32> to vector<8x8x1xi32>
    %27 = vector.broadcast %26 : vector<8x8x1xi32> to vector<8x8x16xi32>
    %28 = arith.cmpi eq, %27, %25 : vector<8x8x16xi32>
    %29 = arith.extui %28 : vector<8x8x16xi1> to vector<8x8x16xi32>
    %30 = arith.sitofp %29 : vector<8x8x16xi32> to vector<8x8x16xf32>
    %31 = arith.truncf %30 : vector<8x8x16xf32> to vector<8x8x16xbf16>
    %32 = vector.shape_cast %31 : vector<8x8x16xbf16> to vector<64x16xbf16>
    %c0_17 = arith.constant 0 : index
    %c128 = arith.constant 128 : index
    %33 = vector.load %arg14[%c0_17, %c128] : memref<64x144xbf16, #tpu.memory_space<vmem>>, vector<64x16xbf16>
    tpu.vector_store %arg14[%c0_17, %c128], %32 {strides = array<i32>} : memref<64x144xbf16, #tpu.memory_space<vmem>>, vector<64x16xbf16>,
    %c0_18 = arith.constant 0 : index
    %c0_19 = arith.constant 0 : index
    %34 = vector.load %arg14[%c0_18, %c0_19] : memref<64x144xbf16, #tpu.memory_space<vmem>>, vector<64x144xbf16>
    %c0_20 = arith.constant 0 : index
    %c0_21 = arith.constant 0 : index
    %35 = vector.load %arg7[%c0_20, %c0_21] : memref<144x128xbf16, #tpu.memory_space<vmem>>, vector<144x128xbf16>
    %cst_22 = arith.constant dense<0.000000e+00> : vector<64x128xf32>
    %36 = tpu.matmul %34, %35, %cst_22 {dimension_numbers = #tpu.dot_dimension_numbers<[1], [0], [0], [1], [0, 0, 1, 1], [], []>} : vector<64x144xbf16>, vector<144x128xbf16>, vector<64x128xf32> -> vector<64x128xf32>
    %37 = vector.shape_cast %36 : vector<64x128xf32> to vector<8x8x128xf32>
    %38 = vector.shape_cast %16 : vector<8x128xf32> to vector<8x1x128xf32>
    %39 = vector.broadcast %38 : vector<8x1x128xf32> to vector<8x8x128xf32>
    %40 = arith.addf %37, %39 : vector<8x8x128xf32>
    %41 = vector.shape_cast %3 : vector<8x128xf32> to vector<1x8x128xf32>
    %42 = vector.broadcast %41 : vector<1x8x128xf32> to vector<8x8x128xf32>
    %43 = arith.addf %40, %42 : vector<8x8x128xf32>
    %cst_23 = arith.constant 0.000000e+00 : f32
    %44 = vector.broadcast %cst_23 : f32 to vector<8x8x128xf32>
    %45 = arith.maximumf %43, %44 : vector<8x8x128xf32>
    %46 = arith.truncf %45 : vector<8x8x128xf32> to vector<8x8x128xbf16>
    %47 = vector.shape_cast %46 : vector<8x8x128xbf16> to vector<64x128xbf16>
    %c0_24 = arith.constant 0 : index
    %c0_25 = arith.constant 0 : index
    %48 = vector.load %arg8[%c0_24, %c0_25] : memref<128x128xbf16, #tpu.memory_space<vmem>>, vector<128x128xbf16>
    %cst_26 = arith.constant dense<0.000000e+00> : vector<64x128xf32>
    %49 = tpu.matmul %47, %48, %cst_26 {dimension_numbers = #tpu.dot_dimension_numbers<[1], [0], [0], [1], [0, 0, 1, 1], [], []>} : vector<64x128xbf16>, vector<128x128xbf16>, vector<64x128xf32> -> vector<64x128xf32>
    %c0_27 = arith.constant 0 : index
    %c0_28 = arith.constant 0 : index
    %50 = vector.load %arg9[%c0_27, %c0_28] : memref<1x128xf32, #tpu.memory_space<vmem>>, vector<1x128xf32>
    %51 = vector.shape_cast %50 : vector<1x128xf32> to vector<128xf32>
    %52 = vector.shape_cast %51 : vector<128xf32> to vector<1x128xf32>
    %53 = vector.broadcast %52 : vector<1x128xf32> to vector<64x128xf32>
    %54 = arith.addf %49, %53 : vector<64x128xf32>
    %cst_29 = arith.constant 0.000000e+00 : f32
    %55 = vector.broadcast %cst_29 : f32 to vector<64x128xf32>
    %56 = arith.maximumf %54, %55 : vector<64x128xf32>
    %57 = vector.shape_cast %56 : vector<64x128xf32> to vector<8x8x128xf32>
    %c0_30 = arith.constant 0 : index
    %c0_31 = arith.constant 0 : index
    %58 = vector.load %arg10[%c0_30, %c0_31] : memref<1x128xf32, #tpu.memory_space<vmem>>, vector<1x128xf32>
    %59 = vector.shape_cast %58 : vector<1x128xf32> to vector<128xf32>
    %60 = vector.shape_cast %59 : vector<128xf32> to vector<1x1x128xf32>
    %61 = vector.broadcast %60 : vector<1x1x128xf32> to vector<8x8x128xf32>
    %62 = arith.mulf %57, %61 : vector<8x8x128xf32>
    %cst_32 = arith.constant dense<0.000000e+00> : vector<8x8xf32>
    %63 = vector.multi_reduction <add>, %62, %cst_32 [2] : vector<8x8x128xf32> to vector<8x8xf32>
    %64 = arith.addf %63, %6 : vector<8x8xf32>
    %cst_33 = arith.constant dense<0xFF800000> : vector<8xf32>
    %65 = vector.multi_reduction <maximumf>, %64, %cst_33 [1] : vector<8x8xf32> to vector<8xf32>
    %66 = vector.shape_cast %65 : vector<8xf32> to vector<8x1xf32>
    %67 = vector.broadcast %66 : vector<8x1xf32> to vector<8x8xf32>
    %68 = arith.subf %64, %67 : vector<8x8xf32>
    %69 = math.exp %68 : vector<8x8xf32>
    %cst_34 = arith.constant dense<0.000000e+00> : vector<8xf32>
    %70 = vector.multi_reduction <add>, %69, %cst_34 [1] : vector<8x8xf32> to vector<8xf32>
    %71 = vector.shape_cast %70 : vector<8xf32> to vector<8x1xf32>
    %72 = tpu.reciprocal %71 {approx = true} : vector<8x1xf32> -> vector<8x1xf32>
    %73 = vector.broadcast %72 : vector<8x1xf32> to vector<8x8xf32>
    %74 = arith.mulf %69, %73 : vector<8x8xf32>
    %75 = arith.truncf %74 : vector<8x8xf32> to vector<8x8xbf16>
    %cst_35 = arith.constant dense<0.000000e+00> : vector<8x128xf32>
    %76 = tpu.matmul %75, %1, %cst_35 {dimension_numbers = #tpu.dot_dimension_numbers<[1], [0], [0], [1], [0, 0, 1, 1], [], []>} : vector<8x8xbf16>, vector<8x128xbf16>, vector<8x128xf32> -> vector<8x128xf32>
    %77 = arith.truncf %76 : vector<8x128xf32> to vector<8x128xbf16>
    %c0_36 = arith.constant 0 : index
    %c0_37 = arith.constant 0 : index
    %78 = vector.load %arg11[%c0_36, %c0_37] : memref<128x128xbf16, #tpu.memory_space<vmem>>, vector<128x128xbf16>
    %cst_38 = arith.constant dense<0.000000e+00> : vector<8x128xf32>
    %79 = tpu.matmul %77, %78, %cst_38 {dimension_numbers = #tpu.dot_dimension_numbers<[1], [0], [0], [1], [0, 0, 1, 1], [], []>} : vector<8x128xbf16>, vector<128x128xbf16>, vector<8x128xf32> -> vector<8x128xf32>
    %80 = arith.addf %17, %79 : vector<8x128xf32>
    %c0_39 = arith.constant 0 : index
    %c0_40 = arith.constant 0 : index
    %81 = vector.load %arg12[%c0_39, %c0_40] : memref<1x128xf32, #tpu.memory_space<vmem>>, vector<1x128xf32>
    %82 = vector.shape_cast %81 : vector<1x128xf32> to vector<128xf32>
    %83 = vector.shape_cast %82 : vector<128xf32> to vector<1x128xf32>
    %84 = vector.broadcast %83 : vector<1x128xf32> to vector<8x128xf32>
    %85 = arith.addf %80, %84 : vector<8x128xf32>
    %86 = arith.negf %85 : vector<8x128xf32>
    %87 = math.exp %86 : vector<8x128xf32>
    %cst_41 = arith.constant 1.000000e+00 : f32
    %88 = vector.broadcast %cst_41 : f32 to vector<8x128xf32>
    %89 = arith.addf %88, %87 : vector<8x128xf32>
    %90 = arith.divf %88, %89 : vector<8x128xf32>
    %91 = arith.extf %13 : vector<8x128xbf16> to vector<8x128xf32>
    %92 = arith.mulf %90, %91 : vector<8x128xf32>
    %cst_42 = arith.constant 1.000000e+00 : f32
    %93 = vector.broadcast %cst_42 : f32 to vector<8x128xf32>
    %94 = arith.subf %93, %90 : vector<8x128xf32>
    %95 = arith.mulf %94, %76 : vector<8x128xf32>
    %96 = arith.addf %92, %95 : vector<8x128xf32>
    %c0_43 = arith.constant 0 : index
    %c0_44 = arith.constant 0 : index
    %c0_45 = arith.constant 0 : index
    %97 = vector.load %arg13[%c0_43, %c0_44, %c0_45] : memref<1x8x128xf32, #tpu.memory_space<vmem>>, vector<1x8x128xf32>
    %98 = vector.shape_cast %97 : vector<1x8x128xf32> to vector<8x128xf32>
    %99 = vector.shape_cast %96 : vector<8x128xf32> to vector<1x8x128xf32>
    tpu.vector_store %arg13[%c0_43, %c0_44, %c0_45], %99 {strides = array<i32>} : memref<1x8x128xf32, #tpu.memory_space<vmem>>, vector<1x8x128xf32>,
    return
  }
  func.func @transform_0(%arg0: i32, %arg1: i32) -> (i32, i32, i32) {
    %c0_i32 = arith.constant 0 : i32
    %c0_i32_0 = arith.constant 0 : i32
    %c0_i32_1 = arith.constant 0 : i32
    return %arg0, %c0_i32, %c0_i32_0 : i32, i32, i32
  }
  func.func @transform_1(%arg0: i32, %arg1: i32) -> (i32, i32, i32) {
    %c0_i32 = arith.constant 0 : i32
    %c0_i32_0 = arith.constant 0 : i32
    %c0_i32_1 = arith.constant 0 : i32
    return %arg0, %c0_i32, %c0_i32_0 : i32, i32, i32
  }
  func.func @transform_2(%arg0: i32, %arg1: i32) -> (i32, i32, i32) {
    %c0_i32 = arith.constant 0 : i32
    %c0_i32_0 = arith.constant 0 : i32
    return %arg0, %arg1, %c0_i32 : i32, i32, i32
  }
  func.func @transform_3(%arg0: i32, %arg1: i32) -> (i32, i32, i32) {
    %c0_i32 = arith.constant 0 : i32
    %c0_i32_0 = arith.constant 0 : i32
    return %arg0, %arg1, %c0_i32 : i32, i32, i32
  }
  func.func @transform_4(%arg0: i32, %arg1: i32) -> (i32, i32) {
    %c0_i32 = arith.constant 0 : i32
    %c0_i32_0 = arith.constant 0 : i32
    %c0_i32_1 = arith.constant 0 : i32
    return %c0_i32, %c0_i32_0 : i32, i32
  }
  func.func @transform_5(%arg0: i32, %arg1: i32) -> (i32, i32) {
    %c0_i32 = arith.constant 0 : i32
    %c0_i32_0 = arith.constant 0 : i32
    %c0_i32_1 = arith.constant 0 : i32
    return %c0_i32, %c0_i32_0 : i32, i32
  }
  func.func @transform_6(%arg0: i32, %arg1: i32) -> (i32, i32) {
    %c0_i32 = arith.constant 0 : i32
    %c0_i32_0 = arith.constant 0 : i32
    %c0_i32_1 = arith.constant 0 : i32
    return %c0_i32, %c0_i32_0 : i32, i32
  }
  func.func @transform_7(%arg0: i32, %arg1: i32) -> (i32, i32) {
    %c0_i32 = arith.constant 0 : i32
    %c0_i32_0 = arith.constant 0 : i32
    %c0_i32_1 = arith.constant 0 : i32
    return %c0_i32, %c0_i32_0 : i32, i32
  }
  func.func @transform_8(%arg0: i32, %arg1: i32) -> (i32, i32) {
    %c0_i32 = arith.constant 0 : i32
    %c0_i32_0 = arith.constant 0 : i32
    %c0_i32_1 = arith.constant 0 : i32
    return %c0_i32, %c0_i32_0 : i32, i32
  }
  func.func @transform_9(%arg0: i32, %arg1: i32) -> (i32, i32) {
    %c0_i32 = arith.constant 0 : i32
    %c0_i32_0 = arith.constant 0 : i32
    %c0_i32_1 = arith.constant 0 : i32
    return %c0_i32, %c0_i32_0 : i32, i32
  }
  func.func @transform_10(%arg0: i32, %arg1: i32) -> (i32, i32) {
    %c0_i32 = arith.constant 0 : i32
    %c0_i32_0 = arith.constant 0 : i32
    %c0_i32_1 = arith.constant 0 : i32
    return %c0_i32, %c0_i32_0 : i32, i32
  }
  func.func @transform_11(%arg0: i32, %arg1: i32) -> (i32, i32, i32) {
    %c0_i32 = arith.constant 0 : i32
    %c0_i32_0 = arith.constant 0 : i32
    return %arg0, %arg1, %c0_i32 : i32, i32, i32
  }
}

</mosaic_0001>

<bundles_post_ra>
// kernel: tpu_custom_call.1
= control target key start
LH: loop header
LB: loop body
LE: loop exit
PB: predicated region body
PF: predicated region fallthrough
CT: control target
= control target key end

     0   :  { %s3631_s0 = inlined_call_operand.hbm [shape: bf16[2,8,128], index: 0, kind: input, shape index: {}]   ;;  %s3632_s1 = inlined_call_operand.hbm [shape: f32[2,8,128], index: 1, kind: input, shape index: {}]   ;;  %s3633_s2 = inlined_call_operand.hbm [shape: bf16[2,8,8], index: 2, kind: input, shape index: {}]   ;;  %s3634_s3 = inlined_call_operand.hbm [shape: s32[2,8,8], index: 3, kind: input, shape index: {}]   ;;  %s3635_s4 = inlined_call_operand.hbm [shape: bf16[128,256], index: 4, kind: input, shape index: {}]   ;;  %s3636_s5 = inlined_call_operand.hbm [shape: bf16[144,128], index: 5, kind: input, shape index: {}]   ;;  %s3637_s6 = inlined_call_operand.hbm [shape: bf16[128,128], index: 6, kind: input, shape index: {}]   ;;  %s3638_s7 = inlined_call_operand.vmem [shape: f32[1,128], index: 7, kind: input, shape index: {}]   ;;  %s3639_s8 = inlined_call_operand.vmem [shape: f32[1,128], index: 8, kind: input, shape index: {}]   ;;  %s3640_s9 = inlined_call_operand.hbm [shape: bf16[128,128], index: 9, kind: input, shape index: {}]   ;;  %s3641_s10 = inlined_call_operand.vmem [shape: f32[1,128], index: 10, kind: input, shape index: {}]   ;;  %s3642_s11 = inlined_call_operand.hbm [shape: f32[2,8,128], index: 11, kind: output, shape index: {}]  }
   0x1   :  { %3659 = sst [smem:[#allocation32_spill]] %s3631_s0 }
   0x2   :  { %3660 = sst [smem:[#allocation33_spill]] %s3632_s1 }
   0x3   :  { %3661 = sst [smem:[#allocation34_spill]] %s3634_s3 }
   0x4   :  { %3662 = sst [smem:[#allocation35_spill]] %s3635_s4 }
   0x5   :  { %3663 = sst [smem:[#allocation36_spill]] %s3636_s5 }
   0x6   :  { %3664 = sst [smem:[#allocation37_spill]] %s3637_s6 }
   0x7   :  { %3665 = sst [smem:[#allocation38_spill]] %s3642_s11 }
   0x8   :  { %16 = vsyncpa [#allocation4], 0 }
   0x9   :  { %18 = vsyncpa [#allocation4 + $0x1], 0 }
   0xa   :  { %19 = vsyncpa [#allocation7], 0 }
   0xb   :  { %21 = vsyncpa [#allocation7 + $0x1], 0 }
   0xc   :  { %22 = vsyncpa [#allocation10], 0 }
   0xd   :  { %24 = vsyncpa [#allocation10 + $0x1], 0 }
   0xe   :  { %25 = vsyncpa [#allocation13], 0 }
   0xf   :  { %26 = vsyncpa [#allocation16], 0 }
  0x10   :  { %27 = vsyncpa [#allocation5], 0 }
  0x11   :  { %29 = vsyncpa [#allocation5 + $0x1], 0  ;;  %s3092_s17 = smov 0   ;;  %s3094_s18 = smov 0  }
  0x12   :  { %s3096_s19 = smov 0   ;;  %s3098_s20 = smov 0  }
  0x13   :  { %s3100_s21 = smov 0   ;;  %s3102_s22 = smov 0  }
  0x14 LB: > { %3666 = sst [smem:[#allocation25_spill]] %s2993_s17  ;;  %s3123_s23 = sadd.s32 4294967295, %s3013_s22   ;;  %s3013_s22 = sphi %s3102_s22, %s35_s22   ;;  %s3009_s21 = sphi %s3100_s21, %s3714_s21   ;;  %s3005_s20 = sphi %s3098_s20, %s3713_s20   ;;  %s3001_s19 = sphi %s3096_s19, %s3709_s19   ;;  %s2997_s18 = sphi %s3094_s18, %s3712_s18   ;;  %s2993_s17 = sphi %s3092_s17, %s3711_s17  }
  0x15   : > { %3667 = sst [smem:[#allocation26_spill]] %s3001_s19  ;;  %s2306_s24 = sadd.s32 4294967294, %s3013_s22  }
  0x16   : > { %3668 = sst [smem:[#allocation27_spill]] %s3005_s20  ;;  %p67_p0 = scmp.ne.s32.totalorder %s2997_s18, %s2993_s17 }
  0x17   : > { %p3643_p1 = scmp.eq.s32.totalorder %s3123_s23, 0  ;;  %p328_p3 = scmp.eq.s32.totalorder %s2306_s24, 1 }
  0x18   : > { %p2307_p5 = scmp.ge.s32.totalorder %s3013_s22, 1  ;;  %p335_p7 = scmp.lt.s32.totalorder %s3013_s22, 3 }
  0x19   : > { %p3132_p4 = por %p3643_p1, %p67_p0  ;;  %p3137_p6 = por %p328_p3, %p67_p0 }
  0x1a   : > { %p3142_p8 = pnand %p2307_p5, %p335_p7  ;;  %s3015_s28 = smov [#allocation11]  }
  0x1b   : > { %s3670_s26 = scalar_select %p3137_p6, 1, 0 }
  0x1c   : > { %s347_s29 = sshll.u32 %s3015_s28, 4  ;;  %p2512_p9 = pneg %p3142_p8  ;;  %s348_s29 = int_to_ptr.vmem [resolvable:$true] %s347_s29 }
  0x1d   : > { %3671 = sst [smem:[#allocation28_spill]] %s3670_s26  ;;  %s3016_s12 = smov [#allocation12]  }
  0x1e   : > { %p3151_p11 = pnand %p2512_p9, %p3643_p1  ;;  %s360_s13 = sshll.u32 %s3016_s12, 4  ;;  %s361_s13 = int_to_ptr.vmem [resolvable:$true] %s360_s13 }
  0x1f   : > { %s2708_s14 = scalar_lea.vmem %s348_s29, 2048  ;;  %p2716_p5 = scmp.lt.s32.totalorder %s348_s29, %s348_s29 }
  0x20   : > { %p2699_p12 = pneg %p3151_p11  ;;  %p2709_p13 = scmp.ne.s32.totalorder %s348_s29, %s2708_s14 }
  0x21   : > { %p2717_p7 = scmp.lt.s32.totalorder %s2708_s14, %s2708_s14 }
  0x22   : > { %p2711_p0 = pnand %p2709_p13, %p2699_p12 }
  0x23   : > { %p2718_p10 = por %p2717_p7, %p2716_p5 }
  0x24   : > { %p2712_p3 = pneg %p2711_p0 }
  0x26   : > { %p2719_p9 = pnand %p2718_p10, %p2712_p3 }
  0x28   : > { %2722 = shalt.err (!%p2719_p9)
}
  0x29   : > { %s3017_s15 = smov 128   ;;  %s3018_s16 = smov 8  }
  0x2a   : > { %s3674_s4 = sld [smem:[#allocation35_spill]]  ;;  %s2734_s12 = scalar_lea.vmem %s361_s13, 1152 }
  0x2b   : > { %p2735_p1 = scmp.ne.s32.totalorder %s361_s13, %s2734_s12  ;;  %p2742_p2 = scmp.lt.s32.totalorder %s361_s13, %s361_s13 }
  0x2c   : > { %p2743_p6 = scmp.lt.s32.totalorder %s2734_s12, %s2734_s12 }
  0x2d   : > { %p2737_p13 = pnand %p2735_p1, %p2699_p12 }
  0x2e   : > { %p2744_p5 = por %p2743_p6, %p2742_p2 }
  0x2f   : > { %p2738_p0 = pneg %p2737_p13 }
  0x30   : > { %2515 = dma.hbm_to_vmem [thread:$0]  (!%p3151_p11), %s3674_s4, 2048, %s348_s29, [#allocation10], %s3017_s15, %s3017_s15, %s3018_s16  }
  0x31   : > { %p2745_p10 = pnand %p2744_p5, %p2738_p0 }
  0x33   : > { %2748 = shalt.err (!%p2745_p10)
}
  0x34   : > { %s3644_s14 = smov 64   ;;  %s3646_s29 = smov 4  }
  0x35   : > { %s3675_s5 = sld [smem:[#allocation36_spill]]  ;;  %s47_s24 = sadd.s32 1, %s3009_s21 }
  0x36   : > { %s54_s28 = sadd.s32 1, %s3001_s19  ;;  %p49_p1 = scmp.ge.s32.totalorder %s47_s24, 2 }
  0x37   : > { %p61_p2 = scmp.ne.s32.totalorder %s3001_s19, %s2997_s18  ;;  %p62_p6 = scmp.eq.s32.totalorder %s3013_s22, 0 }
  0x38   : > { %p2546_p3 = scmp.lt.s32.totalorder %s3013_s22, 2  ;;  %s3716_s24 = smov (%p49_p1, %s47_s24), 0 }
  0x39   : > { %3676 = sst [smem:[#allocation29_spill]] %s3716_s24  ;;  %p63_p7 = por %p62_p6, %p61_p2 }
  0x3a   : > { %p3677_p9 = scmp.eq.s32.totalorder %s3123_s23, 1  ;;  %s51_s15 = ssub.s32 %s3009_s21, %s3716_s24 }
  0x3b   : > { %2518 = dma.hbm_to_vmem [thread:$0]  (!%p3151_p11), %s3675_s5, 1152, %s361_s13, [#allocation13], %s3644_s14, %s3644_s14, %s3646_s29  }
  0x3c   : > { %p3186_p13 = por %p3677_p9, %p61_p2  ;;  %s3193_s13 = sand.u32 1, %s3001_s19  }
  0x3d   : > { %p52_p0 = scmp.eq.s32.totalorder %s51_s15, 0  ;;  %p3195_p5 = pnand %p2546_p3, %p63_p7 }
  0x3e   : > { %s3678_s12 = scalar_select %p3186_p13, 1, 0 }
  0x3f   : > { %s3654_s14 = sand.u32 1, %s3013_s22   ;;  %s3655_s29 = sshll.u32 %s3193_s13, 3 }
  0x40   : > { %3679 = sst [smem:[#allocation30_spill]] %s3678_s12  ;;  %s2316_s5 = sshll.u32 %s3009_s21, 7 }
  0x41   : > { %s3202_s4 = scalar_select %p52_p0, %s3001_s19, %s54_s28  }
  0x42   : > { %s3682_s1 = sld [smem:[#allocation33_spill]]  ;;  %s431_s11 = scalar_lea.vmem [#allocation6], %s3655_s29 }
  0x43   : > { %3681 = sst [smem:[#allocation31_spill]] %s3202_s4  ;;  %s438_s12 = sshll.u32 %s431_s11, 4  ;;  %s439_s12 = int_to_ptr.vmem [resolvable:$true] %s438_s12 }
  0x44   : > { %s3212_s15 = scalar_lea.sflag [#allocation7], %s3654_s14  ;;  %p3657_p10 = pneg %p3195_p5 }
  0x45   : > { %s2762_s20 = scalar_lea.vmem %s439_s12, 128  ;;  %s3021_s28 = smov [#allocation6]  }
  0x46   : > { %p2763_p1 = scmp.ne.s32.totalorder %s439_s12, %s2762_s20  ;;  %s2767_s4 = sshll.u32 %s3021_s28, 4  ;;  %s2768_s4 = int_to_ptr.vmem [resolvable:$false] %s2767_s4 }
  0x47   : > { %s2769_s17 = scalar_lea.vmem %s2768_s4, 256  ;;  %p2770_p3 = scmp.lt.s32.totalorder %s439_s12, %s2768_s4 }
  0x48   : > { %s436_s24 = scalar_lea.hbm %s3682_s1, %s2316_s5  ;;  %p2765_p2 = pnand %p2763_p1, %p3657_p10 }
  0x49   : > { %p2771_p7 = scmp.lt.s32.totalorder %s2769_s17, %s2762_s20 }
  0x4a   : > { %p2766_p6 = pneg %p2765_p2 }
  0x4b   : > { %p2772_p9 = por %p2771_p7, %p2770_p3 }
  0x4d   : > { %p2773_p0 = pnand %p2772_p9, %p2766_p6 }
  0x4f   : > { %2776 = shalt.err (!%p2773_p0)
}
  0x50   : > { %2531 = dma.hbm_to_vmem [thread:$0]  (!%p3195_p5), %s436_s24, 128, %s439_s12, %s3212_s15  }
  0x51   : > { %s3683_s3 = sld [smem:[#allocation34_spill]]  ;;  %s3022_s29 = smov [#allocation14]  }
  0x52   : > { %s373_s1 = sshll.u32 %s3022_s29, 4  ;;  %s3023_s28 = smov [#allocation15]   ;;  %s374_s1 = int_to_ptr.vmem [resolvable:$true] %s373_s1 }
  0x53   : > { %s392_s19 = sshll.u32 %s3023_s28, 4  ;;  %s2788_s4 = scalar_lea.vmem %s374_s1, 1024  ;;  %s393_s19 = int_to_ptr.vmem [resolvable:$true] %s392_s19 }
  0x54   : > { %p2789_p1 = scmp.ne.s32.totalorder %s374_s1, %s2788_s4  ;;  %p2796_p3 = scmp.lt.s32.totalorder %s374_s1, %s374_s1 }
  0x55   : > { %p2797_p7 = scmp.lt.s32.totalorder %s2788_s4, %s2788_s4 }
  0x56   : > { %p2791_p2 = pnand %p2789_p1, %p2699_p12 }
  0x57   : > { %s3225_s14 = scalar_lea.hbm %s3683_s3, %s2316_s5  ;;  %p2798_p9 = por %p2797_p7, %p2796_p3 }
  0x58   : > { %p2792_p6 = pneg %p2791_p2 }
  0x5a   : > { %p2799_p0 = pnand %p2798_p9, %p2792_p6 }
  0x5c   : > { %2802 = shalt.err (!%p2799_p0)
}
  0x5d   : > { %s3684_s5 = smov 4   ;;  %s3685_s20 = smov 64  }
  0x5e   : > { %s3686_s6 = sld [smem:[#allocation37_spill]]  ;;  %s2814_s12 = scalar_lea.vmem %s393_s19, 1024 }
  0x5f   : > { %p2815_p10 = scmp.ne.s32.totalorder %s393_s19, %s2814_s12  ;;  %p2822_p13 = scmp.lt.s32.totalorder %s393_s19, %s393_s19 }
  0x60   : > { %p2823_p3 = scmp.lt.s32.totalorder %s2814_s12, %s2814_s12 }
  0x61   : > { %p2817_p1 = pnand %p2815_p10, %p2699_p12 }
  0x62   : > { %p2824_p6 = por %p2823_p3, %p2822_p13 }
  0x63   : > { %p2818_p2 = pneg %p2817_p1 }
  0x64   : > { %2521 = dma.hbm_to_vmem [thread:$0]  (!%p3151_p11), %s3686_s6, 1024, %s374_s1, [#allocation13], %s3685_s20, %s3685_s20, %s3684_s5  }
  0x65   : > { %p2825_p7 = pnand %p2824_p6, %p2818_p2 }
  0x67   : > { %2828 = shalt.err (!%p2825_p7)
}
  0x68   : > { %2524 = dma.hbm_to_vmem [thread:$0]  (!%p3151_p11), %s3640_s9, 1024, %s393_s19, [#allocation16], %s3685_s20, %s3685_s20, %s3684_s5  }
  0x69   : > { %s2313_s1 = sshll.u32 %s3193_s13, 2  ;;  %s2314_s26 = sshll.u32 %s3009_s21, 6 }
  0x6a   : > { %s3687_s0 = sld [smem:[#allocation32_spill]]  ;;  %s413_s24 = scalar_lea.vmem [#allocation3], %s2313_s1 }
  0x6b   : > { %s420_s12 = sshll.u32 %s413_s24, 4  ;;  %s410_s30 = scalar_lea.sflag [#allocation4], %s3193_s13  ;;  %s421_s12 = int_to_ptr.vmem [resolvable:$true] %s420_s12 }
  0x6c   : > { %s2842_s3 = scalar_lea.vmem %s421_s12, 64  ;;  %p3688_p13 = pneg %p3195_p5 }
  0x6d   : > { %p2843_p12 = scmp.ne.s32.totalorder %s421_s12, %s2842_s3  ;;  %s3024_s17 = smov [#allocation3]  }
  0x6e   : > { %s2847_s11 = sshll.u32 %s3024_s17, 4  ;;  %s2848_s11 = int_to_ptr.vmem [resolvable:$false] %s2847_s11 }
  0x6f   : > { %p2845_p10 = pnand %p2843_p12, %p3688_p13  ;;  %s2849_s19 = scalar_lea.vmem %s2848_s11, 128 }
  0x70   : > { %s418_s29 = scalar_lea.hbm %s3687_s0, %s2314_s26  ;;  %p2850_p11 = scmp.lt.s32.totalorder %s421_s12, %s2848_s11 }
  0x71   : > { %p2846_p9 = pneg %p2845_p10  ;;  %p2851_p0 = scmp.lt.s32.totalorder %s2849_s19, %s2842_s3 }
  0x73   : > { %p2852_p1 = por %p2851_p0, %p2850_p11 }
  0x75   : > { %p2853_p2 = pnand %p2852_p1, %p2846_p9 }
  0x77   : > { %2856 = shalt.err (!%p2853_p2)
}
  0x78   : > { %2528 = dma.hbm_to_vmem [thread:$0]  (!%p3195_p5), %s418_s29, 64, %s421_s12, %s410_s30  }
  0x79   : > { %s455_s28 = scalar_lea.hbm %s3633_s2, %s2314_s26  ;;  %s449_s4 = scalar_lea.vmem [#allocation8], %s2313_s1 }
  0x7a   : > { %s457_s24 = sshll.u32 %s449_s4, 4  ;;  %s3689_s17 = sshll.u32 %s3193_s13, 3  ;;  %s458_s24 = int_to_ptr.vmem [resolvable:$true] %s457_s24 }
  0x7b   : > { %s468_s0 = scalar_lea.vmem [#allocation9], %s3689_s17  ;;  %s2870_s11 = scalar_lea.vmem %s458_s24, 64 }
  0x7c   : > { %s476_s6 = sshll.u32 %s468_s0, 4  ;;  %p2871_p3 = scmp.ne.s32.totalorder %s458_s24, %s2870_s11  ;;  %s477_s6 = int_to_ptr.vmem [resolvable:$true] %s476_s6 }
  0x7d   : > { %p3690_p6 = pmov %p3688_p13  ;;  %s3025_s3 = smov [#allocation8]  }
  0x7e   : > { %s2875_s19 = sshll.u32 %s3025_s3, 4  ;;  %s2876_s19 = int_to_ptr.vmem [resolvable:$false] %s2875_s19 }
  0x7f   : > { %p2873_p7 = pnand %p2871_p3, %p3690_p6  ;;  %s2877_s29 = scalar_lea.vmem %s2876_s19, 128 }
  0x80   : > { %p2878_p13 = scmp.lt.s32.totalorder %s458_s24, %s2876_s19  ;;  %p2879_p10 = scmp.lt.s32.totalorder %s2877_s29, %s2870_s11 }
  0x81   : > { %p2874_p12 = pneg %p2873_p7 }
  0x82   : > { %p2880_p9 = por %p2879_p10, %p2878_p13 }
  0x84   : > { %p2881_p11 = pnand %p2880_p9, %p2874_p12 }
  0x86   : > { %2884 = shalt.err (!%p2881_p11)
}
  0x87   : > { %2534 = dma.hbm_to_vmem [thread:$0]  (!%p3195_p5), %s455_s28, 64, %s458_s24, %s3212_s15  }
  0x88   : > { %s3691_s0 = sand.u32 1, %s3013_s22   ;;  %s2898_s1 = scalar_lea.vmem %s477_s6, 128 }
  0x89   : > { %s465_s13 = scalar_lea.sflag [#allocation10], %s3691_s0  ;;  %p2899_p0 = scmp.ne.s32.totalorder %s477_s6, %s2898_s1 }
  0x8a   : > { %p3692_p1 = pmov %p3690_p6  ;;  %s3026_s26 = smov [#allocation9]  }
  0x8b   : > { %s2903_s12 = sshll.u32 %s3026_s26, 4  ;;  %s2904_s12 = int_to_ptr.vmem [resolvable:$false] %s2903_s12 }
  0x8c   : > { %p2901_p2 = pnand %p2899_p0, %p3692_p1  ;;  %s2905_s30 = scalar_lea.vmem %s2904_s12, 256 }
  0x8d   : > { %p2906_p6 = scmp.lt.s32.totalorder %s477_s6, %s2904_s12  ;;  %p2907_p7 = scmp.lt.s32.totalorder %s2905_s30, %s2898_s1 }
  0x8e   : > { %p2902_p3 = pneg %p2901_p2 }
  0x8f   : > { %p2908_p12 = por %p2907_p7, %p2906_p6 }
  0x91   : > { %p2909_p13 = pnand %p2908_p12, %p2902_p3 }
  0x93   : > { %2912 = shalt.err (!%p2909_p13)
}
  0x94   : > { %2537 = dma.hbm_to_vmem [thread:$0]  (!%p3195_p5), %s3225_s14, 128, %s477_s6, %s465_s13  }
  0x95   : > { %485 = sbr.rel (%p3142_p8) target bundleno = 2090 (0x82a), region = 64  ;;  %s3282_s15 = sand.u32 (!%p3142_p8), 1, %s2997_s18  }
  0x96   : > { %s2322_s5 = sshll.u32 (!%p3142_p8), %s3282_s15, 2  ;;  %s488_s20 = scalar_lea.sflag (!%p3142_p8), [#allocation4], %s3282_s15 }
  0x97   : > { %s3286_s28 = scalar_lea.vmem (!%p3142_p8), [#allocation3], %s2322_s5 }
  0x9a   : > { %2964 = dma.done.wait (%p3132_p4), %s488_s20, 64  }
  0x9b   : > { %2966 = vsyncadd (%p3132_p4), %s488_s20, 4294967232  ;;  %s496_s6 = sand.u32 1, %s3123_s23   ;;  %s3294_s27 = sshll.u32 %s3282_s15, 3 }
  0x9c   : > { %s497_s14 = scalar_lea.sflag [#allocation7], %s496_s6  ;;  %s500_s16 = scalar_lea.vmem [#allocation6], %s3294_s27 }
  0x9d   : > { %2968 = dma.done.wait (%p3132_p4), %s497_s14, 192  }
  0x9e   : > { %2970 = vsyncadd (%p3132_p4), %s497_s14, 4294967104  ;;  %s3301_s4 = scalar_lea.vmem [#allocation8], %s2322_s5  ;;  %s515_s24 = scalar_lea.sflag [#allocation10], %s496_s6 }
  0x9f   : > { %s518_s17 = scalar_lea.vmem [#allocation9], %s3294_s27 }
  0xa0   : > { %2972 = dma.done.wait (%p3132_p4), %s515_s24, 128  }
  0xa1   : > { %2974 = vsyncadd (%p3132_p4), %s515_s24, 4294967168  ;;  %p3693_p8 = scmp.eq.s32.totalorder %s3123_s23, 0 }
  0xa3   : > { %2976 = dma.done.wait (%p3693_p8), [#allocation10], 2048   ;;  %p3694_p5 = pmov %p3693_p8 }
  0xa5   : > { %2978 = vsyncadd (%p3694_p5), [#allocation10], 4294965248  ;;  %p3695_p10 = pmov %p3694_p5 }
  0xa6   : > { %p3696_p9 = pmov %p3694_p5 }
  0xa7   : > { %2980 = dma.done.wait (%p3695_p10), [#allocation13], 2176  }
  0xa8   : > { %2982 = vsyncadd (%p3696_p9), [#allocation13], 4294965120  ;;  %p3697_p11 = pmov %p3694_p5 }
  0xa9   : > { %p3698_p0 = pmov %p3694_p5 }
  0xaa   : > { %2984 = dma.done.wait (%p3697_p11), [#allocation16], 1024  }
  0xab   : > { %2986 = vsyncadd (%p3698_p0), [#allocation16], 4294966272  ;;  %v741_v0 = vlaneseq  ;;  %v3027_v1 = vmov 0   ;;  %v593_v7 = vld [vmem:[%s518_s17] sm:$0xff]  ;;  %v2618_v17 = vld [vmem:[#allocation11 + $0x64] ss:$8 sps:$4 sm:$0xff]  }
  0xac   : > { %1110 = vmatprep.subr.bf16.mxu1 %v3027_v1  ;;  %728 = vmatprep.mubr.bf16.mxu0 %v3027_v1  ;;  %v2614_v10 = vld [vmem:[#allocation11 + $0x74] ss:$8 sps:$4 sm:$0xff]   ;;  %v2616_v11 = vld [vmem:[#allocation11 + $0x70] ss:$8 sps:$4 sm:$0xff]   ;;  %v2620_v19 = vld [vmem:[#allocation11 + $0x60] ss:$8 sps:$4 sm:$0xff]  }
  0xad   : > { %v3323_v2 = vshrl.u32 %v741_v0, 7  ;;  %2612 = vset.pattern.permute.xlu1 %v3027_v1  ;;  %2613 = vset.pattern.permute.xlu0 %v3027_v1  ;;  %v2617_v13 = vld [vmem:[#allocation12 + $0x38] sm:$0xff]   ;;  %v2621_v18 = vld [vmem:[#allocation12 + $0x30] sm:$0xff]   ;;  %v2625_v25 = vld [vmem:[#allocation12 + $0x28] sm:$0xff]   ;;  %v3028_v26 = vmov 1966171168  }
  0xae   : > { %696 = vmatprep.subr.bf16.mxu0 %v2614_v10  ;;  %1111 = vmatpush1.bf16.msra.mxu1 %v2617_v13  ;;  %v2622_v20 = vld [vmem:[#allocation11 + $0x54] ss:$8 sps:$4 sm:$0xff]   ;;  %v739_v27 = vunpack.c.l.s4 %v3028_v26  ;;  %v2624_v28 = vld [vmem:[#allocation11 + $0x50] ss:$8 sps:$4 sm:$0xff]   ;;  %v2626_v29 = vld [vmem:[#allocation11 + $0x44] ss:$8 sps:$4 sm:$0xff]  }
  0xaf   : > { %v3328_v3 = vsub.s32 0, %v3323_v2  ;;  %v3331_v4 = vsub.s32 2, %v3323_v2  ;;  %v3334_v5 = vsub.s32 1, %v3323_v2  ;;  %v3337_v6 = vsub.s32 3, %v3323_v2  ;;  %697 = vmatpush1.bf16.msra.mxu0 %v2616_v11  ;;  %1112 = vmatprep.subr.bf16.mxu1 %v3027_v1  ;;  %v2629_v32 = vld [vmem:[#allocation12 + $0x20] sm:$0xff]   ;;  %v2633_v36 = vld [vmem:[#allocation12 + $0x18] sm:$0xff]  }
  0xb0   : > { %v3342_v12 = vsub.s32 5, %v3323_v2  ;;  %v3347_v16 = vsub.s32 4, %v3323_v2  ;;  %698 = vmatprep.subr.bf16.mxu0 %v2618_v17  ;;  %v3353_v23 = vsub.s32 7, %v3323_v2  ;;  %v3356_v24 = vsub.s32 6, %v3323_v2  ;;  %v2628_v34 = vld [vmem:[#allocation11 + $0x40] ss:$8 sps:$4 sm:$0xff]  }
  0xb1   : > { %v887_v8 = vrot.slane %v593_v7, %v3328_v3  ;;  %v901_v9 = vrot.slane %v593_v7, %v3331_v4  ;;  %v894_v14 = vrot.slane %v593_v7, %v3334_v5  ;;  %v908_v15 = vrot.slane %v593_v7, %v3337_v6  ;;  %v2630_v35 = vld [vmem:[#allocation11 + $0x34] ss:$8 sps:$4 sm:$0xff]   ;;  %v2632_v38 = vld [vmem:[#allocation11 + $0x30] ss:$8 sps:$4 sm:$0xff]   ;;  %v2634_v39 = vld [vmem:[#allocation11 + $0x24] ss:$8 sps:$4 sm:$0xff]  }
  0xb2   : > { %v922_v21 = vrot.slane %v593_v7, %v3342_v12  ;;  %v915_v22 = vrot.slane %v593_v7, %v3347_v16  ;;  %1113 = vmatpush1.bf16.msra.mxu1 %v2621_v18  ;;  %v936_v30 = vrot.slane %v593_v7, %v3353_v23  ;;  %v929_v31 = vrot.slane %v593_v7, %v3356_v24  ;;  %v2636_v40 = vld [vmem:[#allocation11 + $0x20] ss:$8 sps:$4 sm:$0xff]   ;;  %v2637_v41 = vld [vmem:[#allocation12 + $0x10] sm:$0xff]   ;;  %v2642_v49 = vld [vmem:[#allocation11 + $0x4] ss:$8 sps:$4 sm:$0xff]   ;;  %s3699_s0 = sld [smem:[#allocation27_spill]] }
  0xb3   : > { %889 = vbcast.lane.b32.xlu0 %v887_v8, 256  ;;  %903 = vbcast.lane.b32.xlu1 %v901_v9, 256  ;;  %v740_v33 = vunpack.c.0.s8 %v739_v27  ;;  %v3367_v42 = vld [vmem:[%s3286_s28] sm:$0xf]  ;;  %v2641_v45 = vld [vmem:[#allocation12 + $0x8] sm:$0xff]   ;;  %v2645_v54 = vld [vmem:[#allocation12] sm:$0xff]  }
  0xb4   : > { %699 = vmatpush1.bf16.msra.mxu0 %v2620_v19  ;;  %1114 = vmatprep.subr.bf16.mxu1 %v3027_v1  ;;  %v2638_v43 = vld [vmem:[#allocation11 + $0x14] ss:$8 sps:$4 sm:$0xff]   ;;  %v2640_v48 = vld [vmem:[#allocation11 + $0x10] ss:$8 sps:$4 sm:$0xff]   ;;  %v2644_v59 = vld [vmem:[#allocation11] ss:$8 sps:$4 sm:$0xff]  }
  0xb5   : > { %700 = vmatprep.subr.bf16.mxu0 %v2622_v20  ;;  %v3363_v37 = vsub.s32 %v740_v33, %v3323_v2  ;;  %vm972_vm2 = vcmask 125952   ;;  %vm1097_vm9 = vcmask 130048   ;;  %vm1633_vm10 = vcmask 1041409   ;;  %s3700_s13 = sld [smem:[#allocation30_spill]]  ;;  %s587_s26 = scalar_lea.vmem [#allocation17], %s3294_s27 }
  0xb6   : > { %1115 = vmatpush1.bf16.msra.mxu1 %v2625_v25  ;;  %v3384_v25 = vld [vmem:[%s3286_s28] sm:$0xf]  ;;  %vm1635_vm11 = vcmask 1042434   ;;  %vm1637_vm12 = vcmask 1043459   ;;  %vm1639_vm13 = vcmask 1044484   ;;  %vm1641_vm14 = vcmask 1045509  }
  0xb7   : > { %896 = vbcast.lane.b32.xlu0 %v894_v14, 256  ;;  %910 = vbcast.lane.b32.xlu1 %v908_v15, 256  ;;  %v744_v44 = vrot.slane %v3367_v42, %v3363_v37  ;;  %vm1643_vm15 = vcmask 1046534   ;;  %s2118_s12 = sshll.u32 %s587_s26, 4  ;;  %s3701_s20 = sld [smem:[#allocation38_spill]]  ;;  %s2119_s12 = int_to_ptr.vmem [resolvable:$true] %s2118_s12 }
  0xb8   : > { %701 = vmatpush1.bf16.msra.mxu0 %v2624_v28  ;;  %1116 = vmatprep.subr.bf16.mxu1 %v3027_v1  ;;  %s2406_s1 = sshll.u32 %s3699_s0, 7 }
  0xb9   : > { %702 = vmatprep.subr.bf16.mxu0 %v2626_v29  ;;  %v745_v46 = vcombine.high %v744_v44, %v744_v44  ;;  %v752_v47 = vrot.slane %v744_v44, %v3363_v37 }
  0xba   : > { %1117 = vmatpush1.bf16.msra.mxu1 %v2629_v32 }
  0xbb   : > { %924 = vbcast.lane.b32.xlu1 %v922_v21, 256  ;;  %917 = vbcast.lane.b32.xlu0 %v915_v22, 256  ;;  %v759_v50 = vrot.slane %v745_v46, %v3363_v37  ;;  %v760_v51 = vcombine.high %v752_v47, %v752_v47  ;;  %v763_v52 = vunpack.i.h.s16 %v752_v47  ;;  %v2347_v53 = vpack.i.b16 %v752_v47, %v752_v47  ;;  %p3703_p1 = scmp.ne.s32.totalorder %s3700_s13, 0 }
  0xbc   : > { %703 = vmatpush1.bf16.msra.mxu0 %v2628_v34  ;;  %1118 = vmatprep.subr.bf16.mxu1 %v3027_v1  ;;  %v2646_v34 = vld [vmem:[#allocation12 + $0x40] sm:$0xff]   ;;  %v3029_v46 = vmov 0.0  }
  0xbd   : > { %704 = vmatprep.subr.bf16.mxu0 %v2630_v35  ;;  %v761_v55 = vcombine.high %v759_v50, %v759_v50  ;;  %v765_v56 = vunpack.i.h.s16 %v759_v50  ;;  %v767_v57 = vunpack.i.h.s16 %v760_v51  ;;  %v771_v58 = vpack.i.b16 %v763_v52, %v763_v52  ;;  %s3702_s6 = smov %s3701_s20  ;;  %s2116_s14 = scalar_lea.hbm %s3701_s20, %s2406_s1 }
  0xbe   : > { %1119 = vmatpush1.bf16.msra.mxu1 %v2633_v36  ;;  %v2348_v60 = vpack.i.b16 %v759_v50, %v759_v50  ;;  %v2349_v61 = vpack.i.b16 %v760_v51, %v760_v51  ;;  %v781_v62 = vrot.slane %v2347_v53, %v3328_v3 }
  0xbf   : > { %938 = vbcast.lane.b32.xlu1 %v936_v30, 256  ;;  %931 = vbcast.lane.b32.xlu0 %v929_v31, 256  ;;  %v769_v63 = vunpack.i.h.s16 %v761_v55  ;;  %v773_v7 = vpack.i.b16 %v765_v56, %v765_v56  ;;  %v775_v8 = vpack.i.b16 %v767_v57, %v767_v57  ;;  %v2350_v9 = vpack.i.b16 %v761_v55, %v761_v55 }
  0xc0   : > { %705 = vmatpush1.bf16.msra.mxu0 %v2632_v38  ;;  %1120 = vmatprep.subr.bf16.mxu1 %v3027_v1  ;;  %v785_v10 = vrot.slane %v771_v58, %v3328_v3  ;;  %v789_v11 = vrot.slane %v2348_v60, %v3328_v3  ;;  %v797_v13 = vrot.slane %v2349_v61, %v3328_v3 }
  0xc1   : > { %706 = vmatprep.subr.bf16.mxu0 %v2634_v39  ;;  %v777_v14 = vpack.i.b16 %v769_v63, %v769_v63  ;;  %v793_v15 = vrot.slane %v773_v7, %v3328_v3  ;;  %v801_v17 = vrot.slane %v775_v8, %v3328_v3  ;;  %v805_v18 = vrot.slane %v2350_v9, %v3328_v3 }
  0xc2   : > { %1121 = vmatpush1.bf16.msra.mxu1 %v2637_v41  ;;  %v811_v19 = vpack.i.b16 %v781_v62, %v781_v62  ;;  %v818_v20 = vpack.i.b16 %v785_v10, %v785_v10  ;;  %v825_v21 = vpack.i.b16 %v789_v11, %v789_v11  ;;  %v839_v22 = vpack.i.b16 %v797_v13, %v797_v13 }
  0xc3   : > { %1122 = vmatprep.subr.bf16.mxu1 %v3027_v1  ;;  %v809_v26 = vrot.slane %v777_v14, %v3328_v3  ;;  %v832_v27 = vpack.i.b16 %v793_v15, %v793_v15  ;;  %v846_v28 = vpack.i.b16 %v801_v17, %v801_v17  ;;  %v853_v29 = vpack.i.b16 %v805_v18, %v805_v18 }
  0xc4   : > { %707 = vmatpush1.bf16.msra.mxu0 %v2636_v40  ;;  %v816_v30 = vrot.slane %v811_v19, %v3328_v3  ;;  %v823_v31 = vrot.slane %v818_v20, %v3328_v3  ;;  %v830_v32 = vrot.slane %v825_v21, %v3328_v3  ;;  %v844_v33 = vrot.slane %v839_v22, %v3328_v3  ;;  %v3395_v40 = vld [vmem:[#allocation14 + $0x38] sm:$0xff]   ;;  %v2659_v22 = vld [vmem:[#allocation14 + $0x30] sm:$0xff]  }
  0xc5   : > { %708 = vmatprep.subr.bf16.mxu0 %v2638_v43  ;;  %v837_v35 = vrot.slane %v832_v27, %v3328_v3  ;;  %v851_v36 = vrot.slane %v846_v28, %v3328_v3  ;;  %v858_v38 = vrot.slane %v853_v29, %v3328_v3  ;;  %v860_v39 = vpack.i.b16 %v809_v26, %v809_v26  ;;  %v2660_v26 = vld [vmem:[#allocation14 + $0x28] sm:$0xff]  }
  0xc6   : > { %1123 = vmatpush1.bf16.msra.mxu1 %v2641_v45  ;;  %v866_v41 = vmul.bf16 %v816_v30, %v3384_v25  ;;  %v867_v43 = vmul.bf16 %v823_v31, %v3384_v25  ;;  %v868_v44 = vmul.bf16 %v830_v32, %v3384_v25  ;;  %v870_v45 = vmul.bf16 %v844_v33, %v3384_v25 }
  0xc7   : > { %1124 = vmatprep.subr.bf16.mxu1 %v3027_v1  ;;  %v865_v47 = vrot.slane %v860_v39, %v3328_v3  ;;  %v2665_v39 = vld [vmem:[#allocation14] sm:$0xff]  }
  0xc8   : > { %709 = vmatpush1.bf16.msra.mxu0 %v2640_v48  ;;  %v869_v48 = vmul.bf16 %v837_v35, %v3384_v25  ;;  %874 = vst [vmem:[#allocation2] sm:$0xf] %v866_v41  ;;  %875 = vst [vmem:[#allocation2 + $0x8] sm:$0xf] %v867_v43  ;;  %v2662_v35 = vld [vmem:[#allocation14 + $0x18] sm:$0xff]  }
  0xc9   : > { %710 = vmatprep.subr.bf16.mxu0 %v2642_v49  ;;  %v872_v49 = vmul.bf16 %v858_v38, %v3384_v25  ;;  %876 = vst [vmem:[#allocation2 + $0x10] sm:$0xf] %v868_v44  ;;  %878 = vst [vmem:[#allocation2 + $0x20] sm:$0xf] %v870_v45  ;;  %v873_v50 = vmul.bf16 %v865_v47, %v3384_v25  ;;  %v2664_v38 = vld [vmem:[#allocation14 + $0x8] sm:$0xff]  }
  0xca   : > { %1125 = vmatpush1.bf16.msra.mxu1 %v2645_v54  ;;  %877 = vst [vmem:[#allocation2 + $0x18] sm:$0xf] %v869_v48  ;;  %v591_v45 = vld [vmem:[%s3301_s4] sm:$0xf]  ;;  %s2913_s4 = scalar_lea.vmem %s2119_s12, 128 }
  0xcb   : > { %1140 = vmatprep.subr.bf16.mxu1 %v3027_v1  ;;  %v871_v1 = vmul.bf16 %v851_v36, %v3384_v25  ;;  %880 = vst [vmem:[#allocation2 + $0x30] sm:$0xf] %v872_v49  ;;  %881 = vst [vmem:[#allocation2 + $0x38] sm:$0xf] %v873_v50  ;;  %v2663_v36 = vld [vmem:[#allocation14 + $0x10] sm:$0xff]   ;;  %v3444_v47 = vunpack.c.l.bf16 %v591_v45  ;;  %p2914_p4 = scmp.ne.s32.totalorder %s2119_s12, %s2913_s4 }
  0xcc   : > { %711 = vmatpush1.bf16.msra.mxu0 %v2644_v59 }
  0xcd   : > { %2460 = vmatprep.subr.bf16.mxu0 %v3029_v46  ;;  %879 = vst [vmem:[#allocation2 + $0x28] sm:$0xf] %v871_v1  ;;  %v1500_v48 = vrot.slane %v3444_v47, %v3328_v3  ;;  %v1507_v1 = vrot.slane %v3444_v47, %v3334_v5  ;;  %v1514_v49 = vrot.slane %v3444_v47, %v3331_v4  ;;  %p2915_p2 = pnand %p2914_p4, %p3703_p1 }
  0xce   : > { %1141 = vmatpush2.bf16.msra.mxu1 %v2646_v34  ;;  %v2661_v34 = vld [vmem:[#allocation14 + $0x20] sm:$0xff]   ;;  %v1528_v50 = vrot.slane %v3444_v47, %v3347_v16 }
  0xcf   : > { %729 = vmatmul.mubr.bf16.vlgmr.msra.gmra.mxu0 %v3367_v42  ;;  %2436 = vmatprep.subr.bf16.mxu1 %v3395_v40  ;;  %v3410_v42 = vand.u32 127, %v741_v0  ;;  %v2647_v19 = vld [vmem:[#allocation2] ss:$8 sps:$4 sm:$0xff]   ;;  %p2916_p3 = pneg %p2915_p2 }
  0xd0   : > { %1502 = vbcast.lane.b32.xlu1 %v1500_v48, 256  ;;  %1509 = vbcast.lane.b32.xlu0 %v1507_v1, 256 }
  0xd2   : > { %v2657_v33 = vld [vmem:[#allocation2 + $0x30] ss:$8 sps:$4 sm:$0xff]  }
  0xd4   : > { %v2654_v31 = vld [vmem:[#allocation2 + $0x20] ss:$8 sps:$4 sm:$0xff]   ;;  %1516 = vbcast.lane.b32.xlu1 %v1514_v49, 256  ;;  %1530 = vbcast.lane.b32.xlu0 %v1528_v50, 256 }
 0x125   : > { %v890_v51 = vpop.permute.xlu0 %889  ;;  %v904_v52 = vpop.permute.xlu1 %903 }
 0x126   : > { %vm940_vm0 = vcmp.eq.s32.totalorder %v890_v51, %v3410_v42  ;;  %vm942_vm1 = vcmp.eq.s32.totalorder %v904_v52, %v3410_v42  ;;  %v1521_v51 = vrot.slane %v3444_v47, %v3337_v6  ;;  %v1535_v52 = vrot.slane %v3444_v47, %v3342_v12 }
 0x127   : > { %v2351_v53 = vsel %vm940_vm0, 1.0, %v3029_v46  ;;  %v2353_v54 = vsel %vm942_vm1, 1.0, %v3029_v46  ;;  %vm1645_vm0 = vcmask 1047559   ;;  %vm1648_vm1 = vcmask 64512  }
 0x128   : > { %v964_v55 = vpack.c.bf16 %v2351_v53, %v2351_v53  ;;  %v966_v56 = vpack.c.bf16 %v2353_v54, %v2353_v54  ;;  %1523 = vbcast.lane.b32.xlu1 %v1521_v51, 256 }
 0x129   : > { %v897_v57 = vpop.permute.xlu0 %896  ;;  %v911_v58 = vpop.permute.xlu1 %910 }
 0x12a   : > { %973 = vst.msk [vmem:[#allocation2 + $0x4] sm:$0xf] %vm972_vm2, %v964_v55  ;;  %975 = vst.msk [vmem:[#allocation2 + $0x14] sm:$0xf] %vm972_vm2, %v966_v56  ;;  %vm941_vm3 = vcmp.eq.s32.totalorder %v897_v57, %v3410_v42  ;;  %vm943_vm4 = vcmp.eq.s32.totalorder %v911_v58, %v3410_v42 }
 0x12b   : > { %v2352_v0 = vsel %vm941_vm3, 1.0, %v3029_v46  ;;  %v2354_v59 = vsel %vm943_vm4, 1.0, %v3029_v46  ;;  %vm3030_vm3 = vmmov 0  }
 0x12c   : > { %v965_v60 = vpack.c.bf16 %v2352_v0, %v2352_v0  ;;  %v967_v61 = vpack.c.bf16 %v2354_v59, %v2354_v59  ;;  %1537 = vbcast.lane.b32.xlu1 %v1535_v52, 256  ;;  %2462 = vmatprep.mubr.msk.bf16.mxu0 %vm3030_vm3, %v3029_v46 }
 0x12d   : > { %v925_v62 = vpop.permute.xlu1 %924  ;;  %v918_v63 = vpop.permute.xlu0 %917 }
 0x12e   : > { %974 = vst.msk [vmem:[#allocation2 + $0xc] sm:$0xf] %vm972_vm2, %v965_v60  ;;  %976 = vst.msk [vmem:[#allocation2 + $0x1c] sm:$0xf] %vm972_vm2, %v967_v61  ;;  %vm945_vm5 = vcmp.eq.s32.totalorder %v925_v62, %v3410_v42  ;;  %vm944_vm6 = vcmp.eq.s32.totalorder %v918_v63, %v3410_v42  ;;  %v590_v62 = vld [vmem:[%s500_s16] sm:$0xff]  ;;  %s2104_s16 = scalar_lea.sflag [#allocation5], %s3282_s15 }
 0x12f   : > { %v2356_v7 = vsel %vm945_vm5, 1.0, %v3029_v46  ;;  %v2355_v8 = vsel %vm944_vm6, 1.0, %v3029_v46 }
 0x130   : > { %v969_v9 = vpack.c.bf16 %v2356_v7, %v2356_v7  ;;  %v968_v10 = vpack.c.bf16 %v2355_v8, %v2355_v8 }
 0x131   : > { %v939_v11 = vpop.permute.xlu1 %938  ;;  %v932_v13 = vpop.permute.xlu0 %931  ;;  %v983_v27 = vld [vmem:[#allocation2 + $0x10] sm:$0xff] }
 0x132   : > { %978 = vst.msk [vmem:[#allocation2 + $0x2c] sm:$0xf] %vm972_vm2, %v969_v9  ;;  %977 = vst.msk [vmem:[#allocation2 + $0x24] sm:$0xf] %vm972_vm2, %v968_v10  ;;  %vm947_vm7 = vcmp.eq.s32.totalorder %v939_v11, %v3410_v42  ;;  %vm946_vm8 = vcmp.eq.s32.totalorder %v932_v13, %v3410_v42 }
 0x133   : > { %v2358_v14 = vsel %vm947_vm7, 1.0, %v3029_v46  ;;  %v2357_v15 = vsel %vm946_vm8, 1.0, %v3029_v46 }
 0x134   : > { %v971_v17 = vpack.c.bf16 %v2358_v14, %v2358_v14  ;;  %v970_v18 = vpack.c.bf16 %v2357_v15, %v2357_v15 }
 0x135   : > { %v2649_v20 = vld [vmem:[#allocation2 + $0x4] ss:$8 sps:$4 sm:$0xff]   ;;  %v2650_v21 = vld [vmem:[#allocation2 + $0x14] ss:$8 sps:$4 sm:$0xff]  }
 0x136   : > { %980 = vst.msk [vmem:[#allocation2 + $0x3c] sm:$0xf] %vm972_vm2, %v971_v17  ;;  %979 = vst.msk [vmem:[#allocation2 + $0x34] sm:$0xf] %vm972_vm2, %v970_v18  ;;  %2376 = vmatprep.mubr.msk.bf16.mxu1 %vm1097_vm9, %v2649_v20  ;;  %v984_v28 = vld [vmem:[#allocation2 + $0x18] sm:$0xff]  ;;  %vm1933_vm2 = vcmask 1043456  }
 0x137   : > { %1143 = vmatmul.mubr.bf16.vlgmr.msra.gmra.mxu1 %v2647_v19  ;;  %v2361_v30 = vcombine.low %v983_v27, %v984_v28 }
 0x138   : > { %2377 = vmatprep.mubr.msk.bf16.mxu1 %vm1097_vm9, %v2650_v21  ;;  %2437 = vmatpush3.bf16.msra.mxu1 %v3395_v40 }
 0x139   : > { %2438 = vmatprep.subr.bf16.mxu1 %v2659_v22  ;;  %v2652_v29 = vld [vmem:[#allocation2 + $0x24] ss:$8 sps:$4 sm:$0xff]  }
 0x13c   : > { %2439 = vmatpush3.bf16.msra.mxu1 %v2659_v22 }
 0x13d   : > { %2440 = vmatprep.subr.bf16.mxu1 %v2660_v26  ;;  %v2655_v32 = vld [vmem:[#allocation2 + $0x34] ss:$8 sps:$4 sm:$0xff]  }
 0x13f   : > { %1151 = vmatmul.mubr.bf16.gmra.mxu1 %v2361_v30 }
 0x140   : > { %2378 = vmatprep.mubr.msk.bf16.mxu1 %vm1097_vm9, %v2652_v29  ;;  %2441 = vmatpush3.bf16.msra.mxu1 %v2660_v26 }
 0x141   : > { %2442 = vmatprep.subr.bf16.mxu1 %v2661_v34 }
 0x144   : > { %2443 = vmatpush3.bf16.msra.mxu1 %v2661_v34 }
 0x145   : > { %2444 = vmatprep.subr.bf16.mxu1 %v2662_v35 }
 0x147   : > { %1159 = vmatmul.mubr.bf16.gmra.mxu1 %v2654_v31 }
 0x148   : > { %2379 = vmatprep.mubr.msk.bf16.mxu1 %vm1097_vm9, %v2655_v32  ;;  %2445 = vmatpush3.bf16.msra.mxu1 %v2662_v35 }
 0x149   : > { %2446 = vmatprep.subr.bf16.mxu1 %v2663_v36 }
 0x14c   : > { %2447 = vmatpush3.bf16.msra.mxu1 %v2663_v36 }
 0x14d   : > { %2448 = vmatprep.subr.bf16.mxu1 %v2664_v38 }
 0x14f   : > { %1167 = vmatmul.mubr.bf16.gmra.mxu1 %v2657_v33 }
 0x150   : > { %2449 = vmatpush3.bf16.msra.mxu1 %v2664_v38 }
 0x151   : > { %2450 = vmatprep.subr.bf16.mxu1 %v2665_v39 }
 0x154   : > { %2451 = vmatpush3.bf16.msra.mxu1 %v2665_v39 }
 0x18f   : > { %v730_v40 = vpop.f32.mrf.mxu0 }
 0x190   : > { %v1183_v53 = vrot.slane %v730_v40, %v3363_v37  ;;  %v1176_v58 = vcombine.high %v730_v40, %v730_v40 }
 0x191   : > { %v3441_v41 = vpop.f32.mrf.mxu0 }
 0x192   : > { %v1191_v54 = vcombine.high %v1183_v53, %v1183_v53  ;;  %v1199_v55 = vrot.slane %v1183_v53, %v3363_v37  ;;  %v1190_v7 = vrot.slane %v1176_v58, %v3363_v37 }
 0x193   : > { %v734_v43 = vpop.f32.mrf.mxu0 }
 0x194   : > { %v1228_v56 = vrot.slane %v1199_v55, %v3328_v3  ;;  %v1213_v57 = vrot.slane %v1191_v54, %v3363_v37  ;;  %v1221_v61 = vcombine.high %v1199_v55, %v1199_v55  ;;  %v1192_v17 = vcombine.high %v1190_v7, %v1190_v7 }
 0x195   : > { %v735_v44 = vpop.f32.mrf.mxu0  ;;  %v1206_v19 = vrot.slane %v1190_v7, %v3363_v37 }
 0x196   : > { %v1232_v60 = vrot.slane %v1213_v57, %v3328_v3  ;;  %v1236_v11 = vrot.slane %v1221_v61, %v3328_v3  ;;  %v1223_v13 = vcombine.high %v1213_v57, %v1213_v57  ;;  %v1220_v33 = vrot.slane %v1192_v17, %v3363_v37 }
 0x197   : > { %v1244_v32 = vrot.slane %v1206_v19, %v3328_v3  ;;  %v1222_v48 = vcombine.high %v1206_v19, %v1206_v19 }
 0x198   : > { %v1240_v26 = vrot.slane %v1223_v13, %v3328_v3  ;;  %v1248_v43 = vrot.slane %v1220_v33, %v3328_v3  ;;  %v1224_v37 = vcombine.high %v1220_v33, %v1220_v33  ;;  %v2380_v13 = vld [vmem:[%s3638_s7] ss:$0 sm:$0xff] }
 0x199   : > { %v1252_v53 = vrot.slane %v1222_v48, %v3328_v3 }
 0x1f7   : > { %v1144_v0 = vpop.f32.mrf.mxu1 }
 0x1f8   : > { %v1265_v59 = vadd.f32 %v1228_v56, %v1144_v0  ;;  %v1256_v0 = vrot.slane %v1224_v37, %v3328_v3  ;;  %v1549_v37 = vrot.slane %v3444_v47, %v3353_v23 }
 0x1f9   : > { %v1146_v63 = vpop.f32.mrf.mxu1 }
 0x1fa   : > { %v1273_v9 = vadd.f32 %v1265_v59, %v590_v62 }
 0x1fb   : > { %v1147_v8 = vpop.f32.mrf.mxu1 }
 0x1fc   : > { %v1266_v10 = vadd.f32 %v1232_v60, %v1147_v8  ;;  %v1281_v20 = vmax.f32 %v1273_v9, 0.0 }
 0x1fd   : > { %v1149_v14 = vpop.f32.mrf.mxu1 }
 0x1fe   : > { %v1274_v15 = vadd.f32 %v1266_v10, %v590_v62 }
 0x1ff   : > { %v1152_v18 = vpop.f32.mrf.mxu1 }
 0x200   : > { %v1282_v21 = vmax.f32 %v1274_v15, 0.0  ;;  %v1267_v22 = vadd.f32 %v1236_v11, %v1152_v18  ;;  %v2393_v18 = vld [vmem:[%s3639_s8] ss:$0 sm:$0xff] }
 0x201   : > { %v1154_v27 = vpop.f32.mrf.mxu1 }
 0x202   : > { %v2409_v28 = vpack.c.bf16 %v1282_v21, %v1281_v20  ;;  %v1275_v30 = vadd.f32 %v1267_v22, %v590_v62 }
 0x203   : > { %v1155_v29 = vpop.f32.mrf.mxu1 }
 0x204   : > { %v1268_v31 = vadd.f32 %v1240_v26, %v1155_v29  ;;  %2452 = vmatprep.mubr.bf16.mxu1 %v2409_v28  ;;  %v1283_v38 = vmax.f32 %v1275_v30, 0.0 }
 0x205   : > { %v1157_v34 = vpop.f32.mrf.mxu1 }
 0x206   : > { %v1276_v35 = vadd.f32 %v1268_v31, %v590_v62 }
 0x207   : > { %v1160_v36 = vpop.f32.mrf.mxu1 }
 0x208   : > { %v1284_v39 = vmax.f32 %v1276_v35, 0.0  ;;  %v1269_v40 = vadd.f32 %v1244_v32, %v1160_v36 }
 0x209   : > { %v1162_v44 = vpop.f32.mrf.mxu1 }
 0x20a   : > { %v2410_v45 = vpack.c.bf16 %v1284_v39, %v1283_v38  ;;  %v1277_v49 = vadd.f32 %v1269_v40, %v590_v62 }
 0x20b   : > { %v1163_v1 = vpop.f32.mrf.mxu1 }
 0x20c   : > { %v1270_v50 = vadd.f32 %v1248_v43, %v1163_v1  ;;  %2453 = vmatmul.mubr.bf16.vlgmr.msra.gmra.mxu1 %v2410_v45  ;;  %v1285_v55 = vmax.f32 %v1277_v49, 0.0 }
 0x20d   : > { %v1165_v51 = vpop.f32.mrf.mxu1 }
 0x20e   : > { %v1278_v52 = vadd.f32 %v1270_v50, %v590_v62 }
 0x20f   : > { %v1168_v54 = vpop.f32.mrf.mxu1 }
 0x210   : > { %v1286_v56 = vmax.f32 %v1278_v52, 0.0  ;;  %v1271_v57 = vadd.f32 %v1252_v53, %v1168_v54  ;;  %v1542_v54 = vrot.slane %v3444_v47, %v3356_v24 }
 0x211   : > { %v1170_v58 = vpop.f32.mrf.mxu1 }
 0x212   : > { %v2411_v59 = vpack.c.bf16 %v1286_v56, %v1285_v55  ;;  %v1279_v61 = vadd.f32 %v1271_v57, %v590_v62  ;;  %v1503_v55 = vpop.permute.xlu1 %1502  ;;  %v1510_v57 = vpop.permute.xlu0 %1509 }
 0x213   : > { %v1171_v60 = vpop.f32.mrf.mxu1 }
 0x214   : > { %v1272_v63 = vadd.f32 %v1256_v0, %v1171_v60  ;;  %2456 = vmatprep.mubr.bf16.mxu1 %v2411_v59  ;;  %v1287_v9 = vmax.f32 %v1279_v61, 0.0 }
 0x215   : > { %v1173_v7 = vpop.f32.mrf.mxu1 }
 0x216   : > { %v1280_v8 = vadd.f32 %v1272_v63, %v590_v62  ;;  %v1517_v56 = vpop.permute.xlu1 %1516  ;;  %v1531_v0 = vpop.permute.xlu0 %1530 }
 0x218   : > { %v1288_v10 = vmax.f32 %v1280_v8, 0.0 }
 0x21a   : > { %v2412_v11 = vpack.c.bf16 %v1288_v10, %v1287_v9  ;;  %v1524_v58 = vpop.permute.xlu1 %1523 }
 0x21c   : > { %2457 = vmatmul.mubr.bf16.gmra.mxu1 %v2412_v11 }
 0x21e   : > { %v1538_v61 = vpop.permute.xlu1 %1537 }
 0x2cc   : > { %v2454_v14 = vpop.f32.mrf.mxu1 }
 0x2cd   : > { %v1435_v15 = vadd.f32 %v2454_v14, %v2380_v13 }
 0x2ce   : > { %v1426_v17 = vpop.f32.mrf.mxu1 }
 0x2cf   : > { %v1459_v19 = vmax.f32 %v1435_v15, 0.0  ;;  %v1427_v20 = vadd.f32 %v2380_v13, %v1426_v17 }
 0x2d0   : > { %v2455_v21 = vpop.f32.mrf.mxu1 }
 0x2d1   : > { %v1457_v22 = vmax.f32 %v1427_v20, 0.0  ;;  %v1438_v62 = vadd.f32 %v2455_v21, %v2380_v13  ;;  %v1474_v26 = vmul.f32 %v2393_v18, %v1459_v19 }
 0x2d2   : > { %v1429_v27 = vpop.f32.mrf.mxu1 }
 0x2d3   : > { %v1430_v28 = vadd.f32 %v2380_v13, %v1429_v27  ;;  %1484 = vadd.xlane.f32.xlu0 %v1474_v26  ;;  %v1460_v29 = vmax.f32 %v1438_v62, 0.0  ;;  %v1472_v31 = vmul.f32 %v2393_v18, %v1457_v22 }
 0x2d5   : > { %v1458_v30 = vmax.f32 %v1430_v28, 0.0  ;;  %v1475_v33 = vmul.f32 %v2393_v18, %v1460_v29  ;;  %v3498_v28 = vsub.s32 %v3410_v42, %v3323_v2 }
 0x2d7   : > { %1480 = vadd.xlane.f32.xlu0 %v1472_v31  ;;  %v1473_v32 = vmul.f32 %v2393_v18, %v1458_v30 }
 0x2d9   : > { %1482 = vadd.xlane.f32.xlu1 %v1473_v32 }
 0x2db   : > { %1486 = vadd.xlane.f32.xlu0 %v1475_v33 }
 0x2dc   : > { %v2458_v34 = vpop.f32.mrf.mxu1 }
 0x2dd   : > { %v1451_v35 = vadd.f32 %v2458_v34, %v2380_v13 }
 0x2de   : > { %v1442_v36 = vpop.f32.mrf.mxu1 }
 0x2df   : > { %v1463_v38 = vmax.f32 %v1451_v35, 0.0  ;;  %v1443_v39 = vadd.f32 %v2380_v13, %v1442_v36 }
 0x2e0   : > { %v2459_v40 = vpop.f32.mrf.mxu1 }
 0x2e1   : > { %v1461_v43 = vmax.f32 %v1443_v39, 0.0  ;;  %v1454_v44 = vadd.f32 %v2459_v40, %v2380_v13  ;;  %v1478_v45 = vmul.f32 %v2393_v18, %v1463_v38 }
 0x2e2   : > { %v1445_v48 = vpop.f32.mrf.mxu1 }
 0x2e3   : > { %v1464_v1 = vmax.f32 %v1454_v44, 0.0  ;;  %v1446_v49 = vadd.f32 %v2380_v13, %v1445_v48  ;;  %1492 = vadd.xlane.f32.xlu1 %v1478_v45  ;;  %v1476_v51 = vmul.f32 %v2393_v18, %v1461_v43 }
 0x2e5   : > { %v1462_v50 = vmax.f32 %v1446_v49, 0.0  ;;  %v1479_v52 = vmul.f32 %v2393_v18, %v1464_v1 }
 0x2e7   : > { %1488 = vadd.xlane.f32.xlu1 %v1476_v51  ;;  %1494 = vadd.xlane.f32.xlu0 %v1479_v52  ;;  %v1477_v53 = vmul.f32 %v2393_v18, %v1462_v50 }
 0x2eb   : > { %1490 = vadd.xlane.f32.xlu0 %v1477_v53 }
 0x2f8   : > { %1551 = vbcast.lane.b32.xlu1 %v1549_v37, 256 }
 0x301   : > { %1544 = vbcast.lane.b32.xlu0 %v1542_v54, 256 }
 0x35c   : > { %v1485_v59 = vpop.xlane.xlu0 %1484 }
 0x35d   : > { %v3484_v60 = vadd.f32 %v1517_v56, %v1485_v59 }
 0x35f   : > { %1584 = vperm.xlu1 %2612, %v3484_v60  }
 0x360   : > { %v1481_v63 = vpop.xlane.xlu0 %1480 }
 0x361   : > { %v1561_v7 = vadd.f32 %v1503_v55, %v1481_v63 }
 0x362   : > { %v1483_v8 = vpop.xlane.xlu1 %1482 }
 0x363   : > { %v1562_v9 = vadd.f32 %v1510_v57, %v1483_v8  ;;  %1578 = vperm.xlu0 %2613, %v1561_v7  }
 0x364   : > { %v1487_v10 = vpop.xlane.xlu0 %1486 }
 0x365   : > { %v3487_v11 = vadd.f32 %v1524_v58, %v1487_v10  ;;  %1581 = vperm.xlu1 %2612, %v1562_v9  }
 0x367   : > { %1587 = vperm.xlu0 %2613, %v3487_v11  }
 0x36c   : > { %v1493_v47 = vpop.xlane.xlu1 %1492 }
 0x370   : > { %v1489_v13 = vpop.xlane.xlu1 %1488  ;;  %v1495_v14 = vpop.xlane.xlu0 %1494 }
 0x371   : > { %v1565_v15 = vadd.f32 %v1531_v0, %v1489_v13 }
 0x373   : > { %1590 = vperm.xlu1 %2612, %v1565_v15  }
 0x374   : > { %v1491_v17 = vpop.xlane.xlu0 %1490  ;;  %v1552_v19 = vpop.permute.xlu1 %1551 }
 0x375   : > { %v1566_v18 = vadd.f32 %v1538_v61, %v1491_v17  ;;  %v3490_v21 = vadd.f32 %v1552_v19, %v1495_v14 }
 0x377   : > { %1593 = vperm.xlu0 %2613, %v1566_v18  }
 0x378   : > { %v1545_v20 = vpop.permute.xlu0 %1544 }
 0x379   : > { %v3492_v22 = vadd.f32 %v1545_v20, %v1493_v47 }
 0x37b   : > { %1599 = vperm.xlu0 %2613, %v3490_v21   ;;  %1596 = vperm.xlu1 %2612, %v3492_v22  }
 0x3da   : > { %v1585_v62 = vpop.permute.xlu1 %1584 }
 0x3db   : > { %v1612_v34 = vrot.slane %v1585_v62, %v3498_v28 }
 0x3de   : > { %v1579_v26 = vpop.permute.xlu0 %1578 }
 0x3df   : > { %v1604_v30 = vrot.slane %v1579_v26, %v3498_v28 }
 0x3e0   : > { %v1582_v27 = vpop.permute.xlu1 %1581 }
 0x3e1   : > { %v1608_v29 = vrot.slane %v1582_v27, %v3498_v28 }
 0x3e2   : > { %v1588_v31 = vpop.permute.xlu0 %1587 }
 0x3e3   : > { %v1634_v32 = vsel %vm1633_vm10, %v1608_v29, %v1604_v30  ;;  %v1616_v35 = vrot.slane %v1588_v31, %v3498_v28 }
 0x3e4   : > { %v1636_v38 = vsel %vm1635_vm11, %v1612_v34, %v1634_v32 }
 0x3e5   : > { %v1638_v39 = vsel %vm1637_vm12, %v1616_v35, %v1636_v38 }
 0x3ee   : > { %v1591_v33 = vpop.permute.xlu1 %1590 }
 0x3ef   : > { %v1620_v2 = vrot.slane %v1591_v33, %v3498_v28 }
 0x3f1   : > { %v1640_v44 = vsel %vm1639_vm13, %v1620_v2, %v1638_v39 }
 0x3f2   : > { %v1594_v36 = vpop.permute.xlu0 %1593 }
 0x3f3   : > { %v1624_v42 = vrot.slane %v1594_v36, %v3498_v28 }
 0x3f5   : > { %v1642_v1 = vsel %vm1641_vm14, %v1624_v42, %v1640_v44 }
 0x3f6   : > { %v1597_v40 = vpop.permute.xlu1 %1596  ;;  %v1600_v43 = vpop.permute.xlu0 %1599 }
 0x3f7   : > { %v1628_v45 = vrot.slane %v1597_v40, %v3498_v28  ;;  %v1632_v48 = vrot.slane %v1600_v43, %v3498_v28 }
 0x3f9   : > { %v1644_v49 = vsel %vm1643_vm15, %v1628_v45, %v1642_v1 }
 0x3fa   : > { %v1646_v50 = vsel %vm1645_vm0, %v1632_v48, %v1644_v49 }
 0x3fb   : > { %v1649_v51 = vsel %vm1648_vm1, %v1646_v50, -inf }
 0x3fc   : > { %1650 = vmax.xlane.f32.xlu1 %v1649_v51 }
 0x485   : > { %v1651_v52 = vpop.xlane.xlu1 %1650 }
 0x486   : > { %v1656_v53 = vrot.slane %v1651_v52, %v3328_v3  ;;  %v1660_v37 = vrot.slane %v1651_v52, %v3334_v5  ;;  %v1664_v54 = vrot.slane %v1651_v52, %v3331_v4  ;;  %v1668_v58 = vrot.slane %v1651_v52, %v3337_v6 }
 0x487   : > { %v1672_v61 = vrot.slane %v1651_v52, %v3347_v16  ;;  %v1676_v10 = vrot.slane %v1651_v52, %v3342_v12 }
 0x488   : > { %v1693_v55 = vsub.f32 %v1561_v7, %v1656_v53  ;;  %v1694_v56 = vsub.f32 %v1562_v9, %v1660_v37  ;;  %v1695_v0 = vsub.f32 %v3484_v60, %v1664_v54  ;;  %v1696_v63 = vsub.f32 %v3487_v11, %v1668_v58 }
 0x489   : > { %v1697_v47 = vsub.f32 %v1565_v15, %v1672_v61  ;;  %v1680_v7 = vrot.slane %v1651_v52, %v3356_v24  ;;  %v1698_v9 = vsub.f32 %v1566_v18, %v1676_v10  ;;  %v1684_v60 = vrot.slane %v1651_v52, %v3353_v23 }
 0x48a   : > { %v1701_v57 = vmul.f32 1.442695, %v1693_v55  ;;  %v1703_v59 = vmul.f32 1.442695, %v1694_v56  ;;  %v1705_v8 = vmul.f32 1.442695, %v1695_v0 }
 0x48b   : > { %v1707_v13 = vmul.f32 1.442695, %v1696_v63  ;;  %v1709_v14 = vmul.f32 1.442695, %v1697_v47  ;;  %v1699_v19 = vsub.f32 %v3492_v22, %v1680_v7  ;;  %v1711_v11 = vmul.f32 1.442695, %v1698_v9 }
 0x48c   : > { %2674 = vpow2.f32 %v1701_v57  ;;  %v1700_v62 = vsub.f32 %v3490_v21, %v1684_v60 }
 0x48d   : > { %2676 = vpow2.f32 %v1703_v59  ;;  %v1713_v15 = vmul.f32 1.442695, %v1699_v19 }
 0x48e   : > { %2678 = vpow2.f32 %v1705_v8  ;;  %v1715_v18 = vmul.f32 1.442695, %v1700_v62 }
 0x48f   : > { %2680 = vpow2.f32 %v1707_v13 }
 0x490   : > { %2682 = vpow2.f32 %v1709_v14 }
 0x491   : > { %2684 = vpow2.f32 %v1711_v11 }
 0x492   : > { %2686 = vpow2.f32 %v1713_v15 }
 0x493   : > { %2688 = vpow2.f32 %v1715_v18 }
 0x499   : > { %v2675_v17 = vpop.eup %2674 }
 0x49a   : > { %1726 = vperm.xlu0 %2613, %v2675_v17   ;;  %v2677_v20 = vpop.eup %2676 }
 0x49b   : > { %v2679_v26 = vpop.eup %2678 }
 0x49c   : > { %v2681_v27 = vpop.eup %2680 }
 0x49d   : > { %v2683_v29 = vpop.eup %2682 }
 0x49e   : > { %1729 = vperm.xlu0 %2613, %v2677_v20   ;;  %v2685_v30 = vpop.eup %2684 }
 0x49f   : > { %v2687_v22 = vpop.eup %2686 }
 0x4a0   : > { %v3528_v31 = vpop.eup %2688 }
 0x4a2   : > { %1732 = vperm.xlu0 %2613, %v2679_v26  }
 0x4a6   : > { %1735 = vperm.xlu0 %2613, %v2681_v27  }
 0x4aa   : > { %1738 = vperm.xlu0 %2613, %v2683_v29  }
 0x4ae   : > { %1741 = vperm.xlu0 %2613, %v2685_v30  }
 0x4b2   : > { %1744 = vperm.xlu0 %2613, %v2687_v22  }
 0x4b6   : > { %1747 = vperm.xlu0 %2613, %v3528_v31  }
 0x515   : > { %v1727_v21 = vpop.permute.xlu0 %1726 }
 0x516   : > { %v1752_v42 = vrot.slane %v1727_v21, %v3498_v28 }
 0x519   : > { %v1730_v32 = vpop.permute.xlu0 %1729 }
 0x51a   : > { %v1756_v38 = vrot.slane %v1730_v32, %v3498_v28 }
 0x51c   : > { %v1781_v44 = vsel %vm1633_vm10, %v1756_v38, %v1752_v42 }
 0x51d   : > { %v1733_v33 = vpop.permute.xlu0 %1732 }
 0x51e   : > { %v1760_v2 = vrot.slane %v1733_v33, %v3498_v28  ;;  %v1935_v33 = vsel %vm1933_vm2, %v3384_v25, 0 }
 0x51f   : > { %2461 = vmatpush3.bf16.msra.mxu0 %v1935_v33 }
 0x520   : > { %v1782_v48 = vsel %vm1635_vm11, %v1760_v2, %v1781_v44  ;;  %2466 = vmatprep.subr.bf16.mxu0 %v3029_v46 }
 0x521   : > { %v1736_v34 = vpop.permute.xlu0 %1735 }
 0x522   : > { %v1764_v39 = vrot.slane %v1736_v34, %v3498_v28 }
 0x524   : > { %v1783_v49 = vsel %vm1637_vm12, %v1764_v39, %v1782_v48 }
 0x525   : > { %v1739_v35 = vpop.permute.xlu0 %1738 }
 0x526   : > { %v1768_v40 = vrot.slane %v1739_v35, %v3498_v28 }
 0x528   : > { %v1784_v50 = vsel %vm1639_vm13, %v1768_v40, %v1783_v49 }
 0x529   : > { %v1742_v36 = vpop.permute.xlu0 %1741 }
 0x52a   : > { %v1772_v45 = vrot.slane %v1742_v36, %v3498_v28 }
 0x52c   : > { %v1785_v52 = vsel %vm1641_vm14, %v1772_v45, %v1784_v50 }
 0x52d   : > { %v1745_v43 = vpop.permute.xlu0 %1744 }
 0x52e   : > { %v1776_v1 = vrot.slane %v1745_v43, %v3498_v28 }
 0x530   : > { %v1786_v37 = vsel %vm1643_vm15, %v1776_v1, %v1785_v52 }
 0x531   : > { %v1748_v51 = vpop.permute.xlu0 %1747 }
 0x532   : > { %v1780_v53 = vrot.slane %v1748_v51, %v3498_v28 }
 0x534   : > { %v1787_v54 = vsel %vm1645_vm0, %v1780_v53, %v1786_v37  ;;  %v2666_v37 = vld [vmem:[#allocation15 + $0x38] sm:$0xff]  }
 0x535   : > { %v1789_v55 = vsel %vm1648_vm1, %v1787_v54, 0.0 }
 0x536   : > { %1790 = vadd.xlane.f32.xlu0 %v1789_v55  ;;  %v2667_v55 = vld [vmem:[#allocation15 + $0x30] sm:$0xff]  }
 0x5bf   : > { %v1791_v56 = vpop.xlane.xlu0 %1790 }
 0x5c0   : > { %2690 = vrcp.f32 %v1791_v56  ;;  %v2668_v56 = vld [vmem:[#allocation15 + $0x28] sm:$0xff]  }
 0x5cd   : > { %v2691_v57 = vpop.eup %2690 }
 0x5ce   : > { %v1817_v58 = vrot.slane %v2691_v57, %v3342_v12  ;;  %v1797_v0 = vrot.slane %v2691_v57, %v3328_v3  ;;  %v1801_v59 = vrot.slane %v2691_v57, %v3334_v5  ;;  %v1805_v10 = vrot.slane %v2691_v57, %v3331_v4 }
 0x5cf   : > { %v1809_v7 = vrot.slane %v2691_v57, %v3337_v6  ;;  %v1813_v5 = vrot.slane %v2691_v57, %v3347_v16  ;;  %v1821_v4 = vrot.slane %v2691_v57, %v3356_v24 }
 0x5d0   : > { %v1839_v61 = vmul.f32 %v2685_v30, %v1817_v58  ;;  %v1834_v63 = vmul.f32 %v2675_v17, %v1797_v0  ;;  %v1835_v8 = vmul.f32 %v2677_v20, %v1801_v59  ;;  %v1836_v19 = vmul.f32 %v2679_v26, %v1805_v10  ;;  %v2671_v58 = vld [vmem:[#allocation15 + $0x10] sm:$0xff]   ;;  %v2672_v0 = vld [vmem:[#allocation15 + $0x8] sm:$0xff]   ;;  %v2673_v59 = vld [vmem:[#allocation15] sm:$0xff]  }
 0x5d1   : > { %v1837_v3 = vmul.f32 %v2681_v27, %v1809_v7  ;;  %v1838_v62 = vmul.f32 %v2683_v29, %v1813_v5  ;;  %v1840_v18 = vmul.f32 %v2687_v22, %v1821_v4  ;;  %v1825_v30 = vrot.slane %v2691_v57, %v3353_v23  ;;  %v2670_v57 = vld [vmem:[#allocation15 + $0x18] sm:$0xff]   ;;  %v2403_v7 = vld [vmem:[%s3641_s10] ss:$0 sm:$0xff] }
 0x5d2   : > { %v1847_v47 = vpack.c.bf16 %v1839_v61, %v1839_v61  ;;  %v1842_v13 = vpack.c.bf16 %v1834_v63, %v1834_v63  ;;  %v1843_v60 = vpack.c.bf16 %v1835_v8, %v1835_v8  ;;  %v1844_v11 = vpack.c.bf16 %v1836_v19, %v1836_v19  ;;  %v2696_v5 = vld [vmem:[%s3286_s28] sm:$0xf]  ;;  %s3031_s28 = smov [#allocation17]  }
 0x5d3   : > { %v1845_v20 = vpack.c.bf16 %v1837_v3, %v1837_v3  ;;  %v1846_v6 = vpack.c.bf16 %v1838_v62, %v1838_v62  ;;  %v1848_v21 = vpack.c.bf16 %v1840_v18, %v1840_v18  ;;  %v1841_v32 = vmul.f32 %v3528_v31, %v1825_v30  ;;  %s2917_s24 = sshll.u32 %s3031_s28, 4  ;;  %s2918_s24 = int_to_ptr.vmem [resolvable:$false] %s2917_s24 }
 0x5d4   : > { %v1863_v9 = vunpack.c.l.b16 %v1847_v47  ;;  %v1858_v14 = vunpack.c.l.b16 %v1842_v13  ;;  %v1859_v12 = vunpack.c.l.b16 %v1843_v60  ;;  %v1860_v17 = vunpack.c.l.b16 %v1844_v11  ;;  %s2919_s27 = scalar_lea.vmem %s2918_s24, 256  ;;  %p2920_p6 = scmp.lt.s32.totalorder %s2119_s12, %s2918_s24 }
 0x5d5   : > { %v1861_v15 = vunpack.c.l.b16 %v1845_v20  ;;  %v1862_v26 = vunpack.c.l.b16 %v1846_v6  ;;  %v1864_v27 = vunpack.c.l.b16 %v1848_v21  ;;  %v1849_v16 = vpack.c.bf16 %v1841_v32, %v1841_v32  ;;  %p2921_p7 = scmp.lt.s32.totalorder %s2919_s27, %s2913_s4 }
 0x5d6   : > { %1882 = vperm.xlu0 %2613, %v1863_v9   ;;  %1867 = vperm.xlu1 %2612, %v1858_v14  }
 0x5d7   : > { %v1865_v24 = vunpack.c.l.b16 %v1849_v16  ;;  %p2922_p12 = por %p2921_p7, %p2920_p6 }
 0x5d9   : > { %p2923_p13 = pnand %p2922_p12, %p2916_p3 }
 0x5da   : > { %1870 = vperm.xlu1 %2612, %v1859_v12  }
 0x5de   : > { %1873 = vperm.xlu1 %2612, %v1860_v17   ;;  %v2097_v17 = vunpack.c.l.bf16 %v2696_v5 }
 0x5e2   : > { %1876 = vperm.xlu1 %2612, %v1861_v15  }
 0x5e6   : > { %1879 = vperm.xlu1 %2612, %v1862_v26  }
 0x5ea   : > { %1885 = vperm.xlu1 %2612, %v1864_v27  }
 0x5ee   : > { %1888 = vperm.xlu1 %2612, %v1865_v24  }
 0x651   : > { %v1868_v23 = vpop.permute.xlu1 %1867  ;;  %v1883_v39 = vpop.permute.xlu0 %1882 }
 0x652   : > { %v1893_v25 = vrot.slane %v1868_v23, %v3498_v28  ;;  %v1913_v1 = vrot.slane %v1883_v39, %v3498_v28 }
 0x655   : > { %v1871_v29 = vpop.permute.xlu1 %1870 }
 0x656   : > { %v1897_v34 = vrot.slane %v1871_v29, %v3498_v28 }
 0x658   : > { %v1922_v42 = vsel %vm1633_vm10, %v1897_v34, %v1893_v25 }
 0x659   : > { %v1874_v22 = vpop.permute.xlu1 %1873 }
 0x65a   : > { %v1901_v35 = vrot.slane %v1874_v22, %v3498_v28 }
 0x65c   : > { %v1923_v40 = vsel %vm1635_vm11, %v1901_v35, %v1922_v42 }
 0x65d   : > { %v1877_v31 = vpop.permute.xlu1 %1876 }
 0x65e   : > { %v1905_v38 = vrot.slane %v1877_v31, %v3498_v28 }
 0x660   : > { %v1924_v44 = vsel %vm1637_vm12, %v1905_v38, %v1923_v40 }
 0x661   : > { %v1880_v36 = vpop.permute.xlu1 %1879 }
 0x662   : > { %v1909_v2 = vrot.slane %v1880_v36, %v3498_v28 }
 0x664   : > { %v1925_v45 = vsel %vm1639_vm13, %v1909_v2, %v1924_v44 }
 0x665   : > { %v1886_v43 = vpop.permute.xlu1 %1885  ;;  %v1926_v50 = vsel %vm1641_vm14, %v1913_v1, %v1925_v45 }
 0x666   : > { %v1917_v48 = vrot.slane %v1886_v43, %v3498_v28 }
 0x668   : > { %v1927_v52 = vsel %vm1643_vm15, %v1917_v48, %v1926_v50 }
 0x669   : > { %v1889_v49 = vpop.permute.xlu1 %1888 }
 0x66a   : > { %v1921_v51 = vrot.slane %v1889_v49, %v3498_v28  ;;  %v2669_v28 = vld [vmem:[#allocation15 + $0x20] sm:$0xff]  }
 0x66c   : > { %v1928_v53 = vsel %vm1645_vm0, %v1921_v51, %v1927_v52 }
 0x66d   : > { %v1929_v54 = vpack.c.b16 %v1928_v53, %v1928_v53 }
 0x66f   : > { %2463 = vmatmul.mubr.msk.bf16.vlgmr.msra.gmra.mxu0 %vm1648_vm1, %v1929_v54 }
 0x670   : > { %2467 = vmatpush3.bf16.msra.mxu0 %v2666_v37  ;;  %2482 = vmatprep.mubr.msk.bf16.mxu0 %vm3030_vm3, %v3029_v46 }
 0x671   : > { %2468 = vmatprep.subr.bf16.mxu0 %v3029_v46 }
 0x674   : > { %2469 = vmatpush3.bf16.msra.mxu0 %v2667_v55 }
 0x675   : > { %2470 = vmatprep.subr.bf16.mxu0 %v3029_v46 }
 0x678   : > { %2471 = vmatpush3.bf16.msra.mxu0 %v2668_v56 }
 0x679   : > { %2472 = vmatprep.subr.bf16.mxu0 %v3029_v46 }
 0x67c   : > { %2473 = vmatpush3.bf16.msra.mxu0 %v2669_v28 }
 0x67d   : > { %2474 = vmatprep.subr.bf16.mxu0 %v3029_v46 }
 0x680   : > { %2475 = vmatpush3.bf16.msra.mxu0 %v2670_v57 }
 0x681   : > { %2476 = vmatprep.subr.bf16.mxu0 %v3029_v46 }
 0x684   : > { %2477 = vmatpush3.bf16.msra.mxu0 %v2671_v58 }
 0x685   : > { %2478 = vmatprep.subr.bf16.mxu0 %v3029_v46 }
 0x688   : > { %2479 = vmatpush3.bf16.msra.mxu0 %v2672_v0 }
 0x689   : > { %2480 = vmatprep.subr.bf16.mxu0 %v3029_v46 }
 0x68c   : > { %2481 = vmatpush3.bf16.msra.mxu0 %v2673_v59 }
 0x72f   : > { %v1971_v61 = vpop.f32.mrf.mxu0 }
 0x730   : > { %v1977_v63 = vpack.c.bf16 %v1971_v61, %v1971_v61 }
 0x731   : > { %v2464_v8 = vpop.f32.mrf.mxu0 }
 0x732   : > { %2483 = vmatmul.mubr.bf16.vlgmr.msra.gmra.mxu0 %v1977_v63 }
 0x733   : > { %v1974_v10 = vpop.f32.mrf.mxu0 }
 0x735   : > { %v2465_v47 = vpop.f32.mrf.mxu0 }
 0x7f2   : > { %v2076_v13 = vpop.f32.mrf.mxu0 }
 0x7f3   : > { %v2082_v9 = vadd.f32 %v2076_v13, %v3441_v41 }
 0x7f4   : > { %v2484_v14 = vpop.f32.mrf.mxu0 }
 0x7f5   : > { %v2090_v46 = vadd.f32 %v2403_v7, %v2082_v9 }
 0x7f6   : > { %v2079_v60 = vpop.f32.mrf.mxu0 }
 0x7f7   : > { %v2404_v19 = vmul.f32 -1.442695, %v2090_v46 }
 0x7f8   : > { %v2485_v12 = vpop.f32.mrf.mxu0 }
 0x7f9   : > { %2692 = vpow2.f32 %v2404_v19 }
 0x806   : > { %v2693_v11 = vpop.eup %2692 }
 0x807   : > { %v2094_v3 = vadd.f32 1.0, %v2693_v11 }
 0x809   : > { %2694 = vrcp.f32 %v2094_v3 }
 0x816   : > { %v2695_v20 = vpop.eup %2694 }
 0x817   : > { %v2099_v62 = vsub.f32 1.0, %v2695_v20  ;;  %v2098_v4 = vmul.f32 %v2695_v20, %v2097_v17 }
 0x819   : > { %v2100_v41 = vmul.f32 %v2099_v62, %v1971_v61 }
 0x81b   : > { %v2101_v15 = vadd.f32 %v2100_v41, %v2098_v4 }
 0x81d   : > { %2102 = vst [vmem:[%s587_s26] sm:$0xff] %v2101_v15 }
 0x81e   : > { %2926 = shalt.err (!%p2923_p13)
}
 0x81f   : > { %s2927_s17 = scalar_lea.hbm %s2116_s14, 128  ;;  %s2931_s25 = scalar_lea.hbm %s3702_s6, 256 }
 0x820   : > { %p2928_p8 = scmp.ne.s32.totalorder %s2116_s14, %s2927_s17  ;;  %p2932_p9 = scmp.lt.s32.totalorder %s2116_s14, %s3702_s6 }
 0x821   : > { %p2933_p11 = scmp.lt.s32.totalorder %s2931_s25, %s2927_s17 }
 0x822   : > { %p2929_p5 = pnand %p2928_p8, %p3703_p1 }
 0x823   : > { %p2934_p0 = por %p2933_p11, %p2932_p9 }
 0x824   : > { %p2930_p10 = pneg %p2929_p5 }
 0x826   : > { %p2935_p4 = pnand %p2934_p0, %p2930_p10 }
 0x828   : > { %2938 = shalt.err (!%p2935_p4)
}
 0x829   : > { %2510 = dma.vmem_to_hbm [thread:$0]  (%p3703_p1), %s2119_s12, 128, %s2116_s14, %s2104_s16  }
 0x82a PF: > { %s3704_s19 = sld [smem:[#allocation25_spill]]  ;;  %p3707_p3 = scmp.ge.s32.totalorder %s3013_s22, 2 }
 0x82b   : > { %s3705_s29 = sld [smem:[#allocation28_spill]] }
 0x830   : > { %s2130_s0 = sand.u32 1, %s3704_s19  }
 0x831   : > { %p3706_p2 = scmp.ne.s32.totalorder %s3705_s29, 0  ;;  %s2131_s1 = scalar_lea.sflag [#allocation5], %s2130_s0 }
 0x833   : > { %p2539_p6 = pnand %p3707_p3, %p3706_p2 }
 0x835   : > { %p2540_p7 = pneg %p2539_p6 }
 0x837   : > { %2988 = dma.done.wait (%p2540_p7), %s2131_s1, 128  }
 0x838   : > { %2990 = vsyncadd (%p2540_p7), %s2131_s1, 4294967168  ;;  %s35_s22 = sadd.s32 1, %s3013_s22   ;;  %s3708_s26 = sld [smem:[#allocation26_spill]] }
 0x839   : > { %p32_p12 = scmp.ge.s32.totalorder %s35_s22, 4   ;;  %s3709_s19 = sld [smem:[#allocation31_spill]] }
 0x83a   : > { %s3710_s13 = sld [smem:[#allocation29_spill]]  ;;  %s3711_s17 = smov %s2997_s18 }
 0x83b   : > { %s3713_s20 = smov %s3009_s21 }
 0x83c   :  { %34 = sbr.rel (!%p32_p12) target bundleno = 20 (0x14), region = 163 }
 0x83e   : > { %s3712_s18 = smov %s3708_s26 }
 0x840   : > { %s3714_s21 = smov %s3710_s13 }
 0x841   :  { %2136 = vsyncpa [#allocation4], 1 }
 0x842   :  { %2138 = vsyncpa [#allocation4 + $0x1], 1 }
 0x843   :  { %2139 = vsyncpa [#allocation7], 1 }
 0x844   :  { %2141 = vsyncpa [#allocation7 + $0x1], 1 }
 0x845   :  { %2142 = vsyncpa [#allocation10], 1 }
 0x846   :  { %2144 = vsyncpa [#allocation10 + $0x1], 1 }
 0x847   :  { %2145 = vsyncpa [#allocation13], 1 }
 0x848   :  { %2146 = vsyncpa [#allocation16], 1 }
 0x849   :  { %2147 = vsyncpa [#allocation5], 1 }
 0x84a   :  { %2149 = vsyncpa [#allocation5 + $0x1], 1 }

</bundles_post_ra>
